<compile_context>
chip_gen: v7x
topology: tpu7x:2x2x1
jax: 0.10.0
libtpu: 0.0.40
codegen_flags: <defaults>
</compile_context>

<pallas_src>
import functools
import math

import jax
import jax.numpy as jnp
from jax.experimental import pallas as pl
from jax.experimental.pallas import tpu as pltpu


# ----------------------------------------------------------------------------
# Pallas kernel: fused LSTM recurrence (masked by sequence length) + Linear head
# ----------------------------------------------------------------------------

def _lstm_head_kernel(x_ref, len_ref, wx_ref, wh_ref, b_ref, wo_ref, bo_ref,
                      y_ref, h_ref, *, T, H):
    """One batch block of the whole model.

    x_ref:   (BB, T, I)   inputs (batch_first)
    len_ref: (BB, 1)      float32 sequence lengths
    wx_ref:  (I, 4H)      input->gates weight (PyTorch weight_ih_l0, transposed)
    wh_ref:  (H, 4H)      hidden->gates weight (PyTorch weight_hh_l0, transposed)
    b_ref:   (1, 4H)      bias_ih + bias_hh
    wo_ref:  (H, K)       classifier weight (transposed)
    bo_ref:  (1, K)       classifier bias
    y_ref:   (BB, K)      out = Linear(h1)
    h_ref:   (BB, H)      h1 (final hidden state at each sequence's true length)
    """
    BB = x_ref.shape[0]

    x = x_ref[...]                      # (BB, T, I) — whole tile, loaded once
    lens = len_ref[...]                 # (BB, 1)
    wx = wx_ref[...]                    # (I, 4H)
    wh = wh_ref[...]                    # (H, 4H)
    b = b_ref[...]                      # (1, 4H)

    h = jnp.zeros((BB, H), jnp.float32)     # h0 = 0
    c = jnp.zeros((BB, H), jnp.float32)     # c0 = 0

    # Static unroll: T is a trace-time constant (short fixed trip count).
    # NOTE: for long T, the input projection x @ wx could be hoisted into one big
    # (BB*T, I) @ (I, 4H) matmul before the loop; at these sizes per-step dots are
    # already MXU-trivial and avoid strided relayouts.
    for t in range(T):
        x_t = x[:, t, :]                                        # (BB, I)
        g = (jnp.dot(x_t, wx, preferred_element_type=jnp.float32)
             + jnp.dot(h, wh, preferred_element_type=jnp.float32)
             + b)                                               # (BB, 4H), gates i|f|g|o
        i_g = jax.nn.sigmoid(g[:, 0 * H:1 * H])
        f_g = jax.nn.sigmoid(g[:, 1 * H:2 * H])
        c_g = jnp.tanh(g[:, 2 * H:3 * H])
        o_g = jax.nn.sigmoid(g[:, 3 * H:4 * H])
        c_new = f_g * c + i_g * c_g
        h_new = o_g * jnp.tanh(c_new)
        # pack_padded_sequence semantics: state only advances while t < length[b].
        m = (lens > float(t)).astype(jnp.float32)               # (BB, 1)
        c = m * c_new + (1.0 - m) * c
        h = m * h_new + (1.0 - m) * h

    h_ref[...] = h
    # Classifier head fused in the same kernel: out = layer2(h1)
    y_ref[...] = (jnp.dot(h, wo_ref[...], preferred_element_type=jnp.float32)
                  + bo_ref[...])


# ----------------------------------------------------------------------------
# Wrapper
# ----------------------------------------------------------------------------

def lstm_forward(x, lengths, params):
    """x: (B, T, I) float32 (batch_first), lengths: (B,) ints (sorted descending).

    Returns (out, h1) with PyTorch shapes: out (num_layers=1, B, K), h1 (1, B, H).
    """
    B, T, I = x.shape
    H = params['wh'].shape[0]
    G = params['wh'].shape[1]           # 4*H
    K = params['wo'].shape[1]

    # Batch block: 8 rows -> exact sublane tile; keeps a >=2-wide parallel grid
    # axis (both v7x TensorCores) when B >= 16.
    block_b = 8 if B % 8 == 0 else B
    grid = (B // block_b,)

    lens2 = lengths.astype(jnp.float32).reshape(B, 1)

    kernel = functools.partial(_lstm_head_kernel, T=T, H=H)
    y, h1 = pl.pallas_call(
        kernel,
        out_shape=(jax.ShapeDtypeStruct((B, K), jnp.float32),
                   jax.ShapeDtypeStruct((B, H), jnp.float32)),
        grid=grid,
        in_specs=[
            pl.BlockSpec((block_b, T, I), lambda nb: (nb, 0, 0)),   # x
            pl.BlockSpec((block_b, 1), lambda nb: (nb, 0)),         # lengths
            pl.BlockSpec((I, G), lambda nb: (0, 0)),                # wx (resident)
            pl.BlockSpec((H, G), lambda nb: (0, 0)),                # wh (resident)
            pl.BlockSpec((1, G), lambda nb: (0, 0)),                # bias
            pl.BlockSpec((H, K), lambda nb: (0, 0)),                # wo (resident)
            pl.BlockSpec((1, K), lambda nb: (0, 0)),                # bo
        ],
        out_specs=(
            pl.BlockSpec((block_b, K), lambda nb: (nb, 0)),
            pl.BlockSpec((block_b, H), lambda nb: (nb, 0)),
        ),
        compiler_params=pltpu.CompilerParams(dimension_semantics=("parallel",)),
    )(x, lens2, params['wx'], params['wh'], params['b'], params['wo'], params['bo'])

    # num_layers = 1 leading dim, as PyTorch returns (layer2(h1), h1).
    return y[None], h1[None]


# ----------------------------------------------------------------------------
# Deterministic parameter construction (mirrors nn.LSTM / nn.Linear init scheme)
# ----------------------------------------------------------------------------

def build_lstm_params(key, input_size, hidden_size, num_classes):
    k = jax.random.split(key, 6)
    bound = 1.0 / math.sqrt(hidden_size)

    def u(kk, shape):
        return jax.random.uniform(kk, shape, jnp.float32, -bound, bound)

    w_ih = u(k[0], (4 * hidden_size, input_size))   # PyTorch layout, gate order i,f,g,o
    w_hh = u(k[1], (4 * hidden_size, hidden_size))
    b_ih = u(k[2], (4 * hidden_size,))
    b_hh = u(k[3], (4 * hidden_size,))
    w_fc = u(k[4], (num_classes, hidden_size))
    b_fc = u(k[5], (num_classes,))
    return {
        'wx': w_ih.T,                                   # (I, 4H) lane-dense gates
        'wh': w_hh.T,                                   # (H, 4H)
        'b': (b_ih + b_hh).reshape(1, 4 * hidden_size),
        'wo': w_fc.T,                                   # (H, K)
        'bo': b_fc.reshape(1, num_classes),
    }


# ----------------------------------------------------------------------------
# Pure-JAX reference (same math, no Pallas) for a correctness cross-check
# ----------------------------------------------------------------------------

def lstm_reference(x, lengths, params):
    B, T, I = x.shape
    H = params['wh'].shape[0]
    h = jnp.zeros((B, H), jnp.float32)
    c = jnp.zeros((B, H), jnp.float32)
    for t in range(T):
        g = x[:, t, :] @ params['wx'] + h @ params['wh'] + params['b']
        i_g = jax.nn.sigmoid(g[:, :H])
        f_g = jax.nn.sigmoid(g[:, H:2 * H])
        c_g = jnp.tanh(g[:, 2 * H:3 * H])
        o_g = jax.nn.sigmoid(g[:, 3 * H:])
        c_new = f_g * c + i_g * c_g
        h_new = o_g * jnp.tanh(c_new)
        m = (lengths > t).astype(jnp.float32)[:, None]
        c = m * c_new + (1.0 - m) * c
        h = m * h_new + (1.0 - m) * h
    out = h @ params['wo'] + params['bo']
    return out[None], h[None]


# ----------------------------------------------------------------------------
# Main
# ----------------------------------------------------------------------------

if __name__ == "__main__":
    key = jax.random.PRNGKey(0)
    k_params, k_x = jax.random.split(key)

    # Small shapes consistent with the module (hidden chosen so 4*H = 128 lanes;
    # batch chosen so the batch block fills the 8-sublane tile on both TCs).
    B, T = 16, 8
    input_size, hidden_size, num_classes = 8, 32, 8

    params = build_lstm_params(k_params, input_size, hidden_size, num_classes)
    x = jax.random.normal(k_x, (B, T, input_size), jnp.float32)
    # pack_padded_sequence requires lengths sorted in decreasing order.
    lengths = jnp.array([8, 8, 7, 7, 6, 6, 5, 5, 4, 4, 3, 3, 2, 2, 1, 1], jnp.int32)

    fwd = jax.jit(lambda a, l: lstm_forward(a, l, params))
    out, h1 = jax.block_until_ready(fwd(x, lengths))

    assert out.shape == (1, B, num_classes)
    assert h1.shape == (1, B, hidden_size)
    out_ref, h1_ref = lstm_reference(x, lengths, params)
    assert bool(jnp.all(jnp.isfinite(out))) and bool(jnp.all(jnp.isfinite(h1)))
    assert bool(jnp.allclose(out, out_ref, atol=2e-3, rtol=2e-3))
    assert bool(jnp.allclose(h1, h1_ref, atol=2e-3, rtol=2e-3))
    print("KERNEL_OK")
</pallas_src>

<mosaic_0001>
module attributes {stable_mosaic.version = 11 : i64} {
  func.func @_lstm_head_kernel(%arg0: i32, %arg1: memref<8x8x8xf32, #tpu.memory_space<vmem>>, %arg2: memref<8x1xf32, #tpu.memory_space<vmem>>, %arg3: memref<8x128xf32, #tpu.memory_space<vmem>>, %arg4: memref<32x128xf32, #tpu.memory_space<vmem>>, %arg5: memref<1x128xf32, #tpu.memory_space<vmem>>, %arg6: memref<32x8xf32, #tpu.memory_space<vmem>>, %arg7: memref<1x8xf32, #tpu.memory_space<vmem>>, %arg8: memref<8x8xf32, #tpu.memory_space<vmem>>, %arg9: memref<8x32xf32, #tpu.memory_space<vmem>>) attributes {dimension_semantics = [#tpu.dimension_semantics<parallel>], iteration_bounds = array<i64: 2>, scalar_prefetch = 0 : i64, scratch_operands = 0 : i64, tpu.core_type = #tpu.core_type<tc>, window_params = [{transform_indices = @transform_0, window_bounds = array<i64: 8, 8, 8>}, {transform_indices = @transform_1, window_bounds = array<i64: 8, 1>}, {pipeline_mode = #tpu.pipeline_mode<synchronous>, transform_indices = @transform_2, window_bounds = array<i64: 8, 128>}, {pipeline_mode = #tpu.pipeline_mode<synchronous>, transform_indices = @transform_3, window_bounds = array<i64: 32, 128>}, {pipeline_mode = #tpu.pipeline_mode<synchronous>, transform_indices = @transform_4, window_bounds = array<i64: 1, 128>}, {pipeline_mode = #tpu.pipeline_mode<synchronous>, transform_indices = @transform_5, window_bounds = array<i64: 32, 8>}, {pipeline_mode = #tpu.pipeline_mode<synchronous>, transform_indices = @transform_6, window_bounds = array<i64: 1, 8>}, {transform_indices = @transform_7, window_bounds = array<i64: 8, 8>}, {transform_indices = @transform_8, window_bounds = array<i64: 8, 32>}]} {
    %c0 = arith.constant 0 : index
    %c0_0 = arith.constant 0 : index
    %c0_1 = arith.constant 0 : index
    %0 = vector.load %arg1[%c0, %c0_0, %c0_1] : memref<8x8x8xf32, #tpu.memory_space<vmem>>, vector<8x8x8xf32>
    %c0_2 = arith.constant 0 : index
    %c0_3 = arith.constant 0 : index
    %1 = vector.load %arg2[%c0_2, %c0_3] : memref<8x1xf32, #tpu.memory_space<vmem>>, vector<8x1xf32>
    %c0_4 = arith.constant 0 : index
    %c0_5 = arith.constant 0 : index
    %2 = vector.load %arg3[%c0_4, %c0_5] : memref<8x128xf32, #tpu.memory_space<vmem>>, vector<8x128xf32>
    %c0_6 = arith.constant 0 : index
    %c0_7 = arith.constant 0 : index
    %3 = vector.load %arg4[%c0_6, %c0_7] : memref<32x128xf32, #tpu.memory_space<vmem>>, vector<32x128xf32>
    %c0_8 = arith.constant 0 : index
    %c0_9 = arith.constant 0 : index
    %4 = vector.load %arg5[%c0_8, %c0_9] : memref<1x128xf32, #tpu.memory_space<vmem>>, vector<1x128xf32>
    %cst = arith.constant 0.000000e+00 : f32
    %5 = vector.broadcast %cst : f32 to vector<8x32xf32>
    %cst_10 = arith.constant 0.000000e+00 : f32
    %6 = vector.broadcast %cst_10 : f32 to vector<8x32xf32>
    %7 = vector.extract_strided_slice %0 {offsets = [0, 0, 0], sizes = [8, 1, 8], strides = [1, 1, 1]} : vector<8x8x8xf32> to vector<8x1x8xf32>
    %8 = vector.shape_cast %7 : vector<8x1x8xf32> to vector<8x8xf32>
    %cst_11 = arith.constant dense<0.000000e+00> : vector<8x128xf32>
    %9 = tpu.matmul %8, %2, %cst_11 {dimension_numbers = #tpu.dot_dimension_numbers<[1], [0], [0], [1], [0, 0, 1, 1], [], []>} : vector<8x8xf32>, vector<8x128xf32>, vector<8x128xf32> -> vector<8x128xf32>
    %cst_12 = arith.constant dense<0.000000e+00> : vector<8x128xf32>
    %10 = tpu.matmul %5, %3, %cst_12 {dimension_numbers = #tpu.dot_dimension_numbers<[1], [0], [0], [1], [0, 0, 1, 1], [], []>} : vector<8x32xf32>, vector<32x128xf32>, vector<8x128xf32> -> vector<8x128xf32>
    %11 = arith.addf %9, %10 : vector<8x128xf32>
    %12 = vector.broadcast %4 : vector<1x128xf32> to vector<8x128xf32>
    %13 = arith.addf %11, %12 : vector<8x128xf32>
    %14 = vector.extract_strided_slice %13 {offsets = [0, 0], sizes = [8, 32], strides = [1, 1]} : vector<8x128xf32> to vector<8x32xf32>
    %15 = arith.negf %14 : vector<8x32xf32>
    %16 = math.exp %15 : vector<8x32xf32>
    %cst_13 = arith.constant 1.000000e+00 : f32
    %17 = vector.broadcast %cst_13 : f32 to vector<8x32xf32>
    %18 = arith.addf %17, %16 : vector<8x32xf32>
    %19 = arith.divf %17, %18 : vector<8x32xf32>
    %20 = vector.extract_strided_slice %13 {offsets = [0, 32], sizes = [8, 32], strides = [1, 1]} : vector<8x128xf32> to vector<8x32xf32>
    %21 = arith.negf %20 : vector<8x32xf32>
    %22 = math.exp %21 : vector<8x32xf32>
    %cst_14 = arith.constant 1.000000e+00 : f32
    %23 = vector.broadcast %cst_14 : f32 to vector<8x32xf32>
    %24 = arith.addf %23, %22 : vector<8x32xf32>
    %25 = arith.divf %23, %24 : vector<8x32xf32>
    %26 = vector.extract_strided_slice %13 {offsets = [0, 64], sizes = [8, 32], strides = [1, 1]} : vector<8x128xf32> to vector<8x32xf32>
    %27 = math.tanh %26 : vector<8x32xf32>
    %28 = vector.extract_strided_slice %13 {offsets = [0, 96], sizes = [8, 32], strides = [1, 1]} : vector<8x128xf32> to vector<8x32xf32>
    %29 = arith.negf %28 : vector<8x32xf32>
    %30 = math.exp %29 : vector<8x32xf32>
    %cst_15 = arith.constant 1.000000e+00 : f32
    %31 = vector.broadcast %cst_15 : f32 to vector<8x32xf32>
    %32 = arith.addf %31, %30 : vector<8x32xf32>
    %33 = arith.divf %31, %32 : vector<8x32xf32>
    %34 = arith.mulf %25, %6 : vector<8x32xf32>
    %35 = arith.mulf %19, %27 : vector<8x32xf32>
    %36 = arith.addf %34, %35 : vector<8x32xf32>
    %37 = math.tanh %36 : vector<8x32xf32>
    %38 = arith.mulf %33, %37 : vector<8x32xf32>
    %cst_16 = arith.constant 0.000000e+00 : f32
    %39 = vector.broadcast %cst_16 : f32 to vector<8x1xf32>
    %40 = arith.cmpf ogt, %1, %39 : vector<8x1xf32>
    %41 = arith.extui %40 : vector<8x1xi1> to vector<8x1xi32>
    %42 = arith.sitofp %41 : vector<8x1xi32> to vector<8x1xf32>
    %43 = vector.broadcast %42 : vector<8x1xf32> to vector<8x32xf32>
    %44 = arith.mulf %43, %36 : vector<8x32xf32>
    %cst_17 = arith.constant 1.000000e+00 : f32
    %45 = vector.broadcast %cst_17 : f32 to vector<8x1xf32>
    %46 = arith.subf %45, %42 : vector<8x1xf32>
    %47 = vector.broadcast %46 : vector<8x1xf32> to vector<8x32xf32>
    %48 = arith.mulf %47, %6 : vector<8x32xf32>
    %49 = arith.addf %44, %48 : vector<8x32xf32>
    %50 = vector.broadcast %42 : vector<8x1xf32> to vector<8x32xf32>
    %51 = arith.mulf %50, %38 : vector<8x32xf32>
    %cst_18 = arith.constant 1.000000e+00 : f32
    %52 = vector.broadcast %cst_18 : f32 to vector<8x1xf32>
    %53 = arith.subf %52, %42 : vector<8x1xf32>
    %54 = vector.broadcast %53 : vector<8x1xf32> to vector<8x32xf32>
    %55 = arith.mulf %54, %5 : vector<8x32xf32>
    %56 = arith.addf %51, %55 : vector<8x32xf32>
    %57 = vector.extract_strided_slice %0 {offsets = [0, 1, 0], sizes = [8, 1, 8], strides = [1, 1, 1]} : vector<8x8x8xf32> to vector<8x1x8xf32>
    %58 = vector.shape_cast %57 : vector<8x1x8xf32> to vector<8x8xf32>
    %cst_19 = arith.constant dense<0.000000e+00> : vector<8x128xf32>
    %59 = tpu.matmul %58, %2, %cst_19 {dimension_numbers = #tpu.dot_dimension_numbers<[1], [0], [0], [1], [0, 0, 1, 1], [], []>} : vector<8x8xf32>, vector<8x128xf32>, vector<8x128xf32> -> vector<8x128xf32>
    %cst_20 = arith.constant dense<0.000000e+00> : vector<8x128xf32>
    %60 = tpu.matmul %56, %3, %cst_20 {dimension_numbers = #tpu.dot_dimension_numbers<[1], [0], [0], [1], [0, 0, 1, 1], [], []>} : vector<8x32xf32>, vector<32x128xf32>, vector<8x128xf32> -> vector<8x128xf32>
    %61 = arith.addf %59, %60 : vector<8x128xf32>
    %62 = vector.broadcast %4 : vector<1x128xf32> to vector<8x128xf32>
    %63 = arith.addf %61, %62 : vector<8x128xf32>
    %64 = vector.extract_strided_slice %63 {offsets = [0, 0], sizes = [8, 32], strides = [1, 1]} : vector<8x128xf32> to vector<8x32xf32>
    %65 = arith.negf %64 : vector<8x32xf32>
    %66 = math.exp %65 : vector<8x32xf32>
    %cst_21 = arith.constant 1.000000e+00 : f32
    %67 = vector.broadcast %cst_21 : f32 to vector<8x32xf32>
    %68 = arith.addf %67, %66 : vector<8x32xf32>
    %69 = arith.divf %67, %68 : vector<8x32xf32>
    %70 = vector.extract_strided_slice %63 {offsets = [0, 32], sizes = [8, 32], strides = [1, 1]} : vector<8x128xf32> to vector<8x32xf32>
    %71 = arith.negf %70 : vector<8x32xf32>
    %72 = math.exp %71 : vector<8x32xf32>
    %cst_22 = arith.constant 1.000000e+00 : f32
    %73 = vector.broadcast %cst_22 : f32 to vector<8x32xf32>
    %74 = arith.addf %73, %72 : vector<8x32xf32>
    %75 = arith.divf %73, %74 : vector<8x32xf32>
    %76 = vector.extract_strided_slice %63 {offsets = [0, 64], sizes = [8, 32], strides = [1, 1]} : vector<8x128xf32> to vector<8x32xf32>
    %77 = math.tanh %76 : vector<8x32xf32>
    %78 = vector.extract_strided_slice %63 {offsets = [0, 96], sizes = [8, 32], strides = [1, 1]} : vector<8x128xf32> to vector<8x32xf32>
    %79 = arith.negf %78 : vector<8x32xf32>
    %80 = math.exp %79 : vector<8x32xf32>
    %cst_23 = arith.constant 1.000000e+00 : f32
    %81 = vector.broadcast %cst_23 : f32 to vector<8x32xf32>
    %82 = arith.addf %81, %80 : vector<8x32xf32>
    %83 = arith.divf %81, %82 : vector<8x32xf32>
    %84 = arith.mulf %75, %49 : vector<8x32xf32>
    %85 = arith.mulf %69, %77 : vector<8x32xf32>
    %86 = arith.addf %84, %85 : vector<8x32xf32>
    %87 = math.tanh %86 : vector<8x32xf32>
    %88 = arith.mulf %83, %87 : vector<8x32xf32>
    %cst_24 = arith.constant 1.000000e+00 : f32
    %89 = vector.broadcast %cst_24 : f32 to vector<8x1xf32>
    %90 = arith.cmpf ogt, %1, %89 : vector<8x1xf32>
    %91 = arith.extui %90 : vector<8x1xi1> to vector<8x1xi32>
    %92 = arith.sitofp %91 : vector<8x1xi32> to vector<8x1xf32>
    %93 = vector.broadcast %92 : vector<8x1xf32> to vector<8x32xf32>
    %94 = arith.mulf %93, %86 : vector<8x32xf32>
    %cst_25 = arith.constant 1.000000e+00 : f32
    %95 = vector.broadcast %cst_25 : f32 to vector<8x1xf32>
    %96 = arith.subf %95, %92 : vector<8x1xf32>
    %97 = vector.broadcast %96 : vector<8x1xf32> to vector<8x32xf32>
    %98 = arith.mulf %97, %49 : vector<8x32xf32>
    %99 = arith.addf %94, %98 : vector<8x32xf32>
    %100 = vector.broadcast %92 : vector<8x1xf32> to vector<8x32xf32>
    %101 = arith.mulf %100, %88 : vector<8x32xf32>
    %cst_26 = arith.constant 1.000000e+00 : f32
    %102 = vector.broadcast %cst_26 : f32 to vector<8x1xf32>
    %103 = arith.subf %102, %92 : vector<8x1xf32>
    %104 = vector.broadcast %103 : vector<8x1xf32> to vector<8x32xf32>
    %105 = arith.mulf %104, %56 : vector<8x32xf32>
    %106 = arith.addf %101, %105 : vector<8x32xf32>
    %107 = vector.extract_strided_slice %0 {offsets = [0, 2, 0], sizes = [8, 1, 8], strides = [1, 1, 1]} : vector<8x8x8xf32> to vector<8x1x8xf32>
    %108 = vector.shape_cast %107 : vector<8x1x8xf32> to vector<8x8xf32>
    %cst_27 = arith.constant dense<0.000000e+00> : vector<8x128xf32>
    %109 = tpu.matmul %108, %2, %cst_27 {dimension_numbers = #tpu.dot_dimension_numbers<[1], [0], [0], [1], [0, 0, 1, 1], [], []>} : vector<8x8xf32>, vector<8x128xf32>, vector<8x128xf32> -> vector<8x128xf32>
    %cst_28 = arith.constant dense<0.000000e+00> : vector<8x128xf32>
    %110 = tpu.matmul %106, %3, %cst_28 {dimension_numbers = #tpu.dot_dimension_numbers<[1], [0], [0], [1], [0, 0, 1, 1], [], []>} : vector<8x32xf32>, vector<32x128xf32>, vector<8x128xf32> -> vector<8x128xf32>
    %111 = arith.addf %109, %110 : vector<8x128xf32>
    %112 = vector.broadcast %4 : vector<1x128xf32> to vector<8x128xf32>
    %113 = arith.addf %111, %112 : vector<8x128xf32>
    %114 = vector.extract_strided_slice %113 {offsets = [0, 0], sizes = [8, 32], strides = [1, 1]} : vector<8x128xf32> to vector<8x32xf32>
    %115 = arith.negf %114 : vector<8x32xf32>
    %116 = math.exp %115 : vector<8x32xf32>
    %cst_29 = arith.constant 1.000000e+00 : f32
    %117 = vector.broadcast %cst_29 : f32 to vector<8x32xf32>
    %118 = arith.addf %117, %116 : vector<8x32xf32>
    %119 = arith.divf %117, %118 : vector<8x32xf32>
    %120 = vector.extract_strided_slice %113 {offsets = [0, 32], sizes = [8, 32], strides = [1, 1]} : vector<8x128xf32> to vector<8x32xf32>
    %121 = arith.negf %120 : vector<8x32xf32>
    %122 = math.exp %121 : vector<8x32xf32>
    %cst_30 = arith.constant 1.000000e+00 : f32
    %123 = vector.broadcast %cst_30 : f32 to vector<8x32xf32>
    %124 = arith.addf %123, %122 : vector<8x32xf32>
    %125 = arith.divf %123, %124 : vector<8x32xf32>
    %126 = vector.extract_strided_slice %113 {offsets = [0, 64], sizes = [8, 32], strides = [1, 1]} : vector<8x128xf32> to vector<8x32xf32>
    %127 = math.tanh %126 : vector<8x32xf32>
    %128 = vector.extract_strided_slice %113 {offsets = [0, 96], sizes = [8, 32], strides = [1, 1]} : vector<8x128xf32> to vector<8x32xf32>
    %129 = arith.negf %128 : vector<8x32xf32>
    %130 = math.exp %129 : vector<8x32xf32>
    %cst_31 = arith.constant 1.000000e+00 : f32
    %131 = vector.broadcast %cst_31 : f32 to vector<8x32xf32>
    %132 = arith.addf %131, %130 : vector<8x32xf32>
    %133 = arith.divf %131, %132 : vector<8x32xf32>
    %134 = arith.mulf %125, %99 : vector<8x32xf32>
    %135 = arith.mulf %119, %127 : vector<8x32xf32>
    %136 = arith.addf %134, %135 : vector<8x32xf32>
    %137 = math.tanh %136 : vector<8x32xf32>
    %138 = arith.mulf %133, %137 : vector<8x32xf32>
    %cst_32 = arith.constant 2.000000e+00 : f32
    %139 = vector.broadcast %cst_32 : f32 to vector<8x1xf32>
    %140 = arith.cmpf ogt, %1, %139 : vector<8x1xf32>
    %141 = arith.extui %140 : vector<8x1xi1> to vector<8x1xi32>
    %142 = arith.sitofp %141 : vector<8x1xi32> to vector<8x1xf32>
    %143 = vector.broadcast %142 : vector<8x1xf32> to vector<8x32xf32>
    %144 = arith.mulf %143, %136 : vector<8x32xf32>
    %cst_33 = arith.constant 1.000000e+00 : f32
    %145 = vector.broadcast %cst_33 : f32 to vector<8x1xf32>
    %146 = arith.subf %145, %142 : vector<8x1xf32>
    %147 = vector.broadcast %146 : vector<8x1xf32> to vector<8x32xf32>
    %148 = arith.mulf %147, %99 : vector<8x32xf32>
    %149 = arith.addf %144, %148 : vector<8x32xf32>
    %150 = vector.broadcast %142 : vector<8x1xf32> to vector<8x32xf32>
    %151 = arith.mulf %150, %138 : vector<8x32xf32>
    %cst_34 = arith.constant 1.000000e+00 : f32
    %152 = vector.broadcast %cst_34 : f32 to vector<8x1xf32>
    %153 = arith.subf %152, %142 : vector<8x1xf32>
    %154 = vector.broadcast %153 : vector<8x1xf32> to vector<8x32xf32>
    %155 = arith.mulf %154, %106 : vector<8x32xf32>
    %156 = arith.addf %151, %155 : vector<8x32xf32>
    %157 = vector.extract_strided_slice %0 {offsets = [0, 3, 0], sizes = [8, 1, 8], strides = [1, 1, 1]} : vector<8x8x8xf32> to vector<8x1x8xf32>
    %158 = vector.shape_cast %157 : vector<8x1x8xf32> to vector<8x8xf32>
    %cst_35 = arith.constant dense<0.000000e+00> : vector<8x128xf32>
    %159 = tpu.matmul %158, %2, %cst_35 {dimension_numbers = #tpu.dot_dimension_numbers<[1], [0], [0], [1], [0, 0, 1, 1], [], []>} : vector<8x8xf32>, vector<8x128xf32>, vector<8x128xf32> -> vector<8x128xf32>
    %cst_36 = arith.constant dense<0.000000e+00> : vector<8x128xf32>
    %160 = tpu.matmul %156, %3, %cst_36 {dimension_numbers = #tpu.dot_dimension_numbers<[1], [0], [0], [1], [0, 0, 1, 1], [], []>} : vector<8x32xf32>, vector<32x128xf32>, vector<8x128xf32> -> vector<8x128xf32>
    %161 = arith.addf %159, %160 : vector<8x128xf32>
    %162 = vector.broadcast %4 : vector<1x128xf32> to vector<8x128xf32>
    %163 = arith.addf %161, %162 : vector<8x128xf32>
    %164 = vector.extract_strided_slice %163 {offsets = [0, 0], sizes = [8, 32], strides = [1, 1]} : vector<8x128xf32> to vector<8x32xf32>
    %165 = arith.negf %164 : vector<8x32xf32>
    %166 = math.exp %165 : vector<8x32xf32>
    %cst_37 = arith.constant 1.000000e+00 : f32
    %167 = vector.broadcast %cst_37 : f32 to vector<8x32xf32>
    %168 = arith.addf %167, %166 : vector<8x32xf32>
    %169 = arith.divf %167, %168 : vector<8x32xf32>
    %170 = vector.extract_strided_slice %163 {offsets = [0, 32], sizes = [8, 32], strides = [1, 1]} : vector<8x128xf32> to vector<8x32xf32>
    %171 = arith.negf %170 : vector<8x32xf32>
    %172 = math.exp %171 : vector<8x32xf32>
    %cst_38 = arith.constant 1.000000e+00 : f32
    %173 = vector.broadcast %cst_38 : f32 to vector<8x32xf32>
    %174 = arith.addf %173, %172 : vector<8x32xf32>
    %175 = arith.divf %173, %174 : vector<8x32xf32>
    %176 = vector.extract_strided_slice %163 {offsets = [0, 64], sizes = [8, 32], strides = [1, 1]} : vector<8x128xf32> to vector<8x32xf32>
    %177 = math.tanh %176 : vector<8x32xf32>
    %178 = vector.extract_strided_slice %163 {offsets = [0, 96], sizes = [8, 32], strides = [1, 1]} : vector<8x128xf32> to vector<8x32xf32>
    %179 = arith.negf %178 : vector<8x32xf32>
    %180 = math.exp %179 : vector<8x32xf32>
    %cst_39 = arith.constant 1.000000e+00 : f32
    %181 = vector.broadcast %cst_39 : f32 to vector<8x32xf32>
    %182 = arith.addf %181, %180 : vector<8x32xf32>
    %183 = arith.divf %181, %182 : vector<8x32xf32>
    %184 = arith.mulf %175, %149 : vector<8x32xf32>
    %185 = arith.mulf %169, %177 : vector<8x32xf32>
    %186 = arith.addf %184, %185 : vector<8x32xf32>
    %187 = math.tanh %186 : vector<8x32xf32>
    %188 = arith.mulf %183, %187 : vector<8x32xf32>
    %cst_40 = arith.constant 3.000000e+00 : f32
    %189 = vector.broadcast %cst_40 : f32 to vector<8x1xf32>
    %190 = arith.cmpf ogt, %1, %189 : vector<8x1xf32>
    %191 = arith.extui %190 : vector<8x1xi1> to vector<8x1xi32>
    %192 = arith.sitofp %191 : vector<8x1xi32> to vector<8x1xf32>
    %193 = vector.broadcast %192 : vector<8x1xf32> to vector<8x32xf32>
    %194 = arith.mulf %193, %186 : vector<8x32xf32>
    %cst_41 = arith.constant 1.000000e+00 : f32
    %195 = vector.broadcast %cst_41 : f32 to vector<8x1xf32>
    %196 = arith.subf %195, %192 : vector<8x1xf32>
    %197 = vector.broadcast %196 : vector<8x1xf32> to vector<8x32xf32>
    %198 = arith.mulf %197, %149 : vector<8x32xf32>
    %199 = arith.addf %194, %198 : vector<8x32xf32>
    %200 = vector.broadcast %192 : vector<8x1xf32> to vector<8x32xf32>
    %201 = arith.mulf %200, %188 : vector<8x32xf32>
    %cst_42 = arith.constant 1.000000e+00 : f32
    %202 = vector.broadcast %cst_42 : f32 to vector<8x1xf32>
    %203 = arith.subf %202, %192 : vector<8x1xf32>
    %204 = vector.broadcast %203 : vector<8x1xf32> to vector<8x32xf32>
    %205 = arith.mulf %204, %156 : vector<8x32xf32>
    %206 = arith.addf %201, %205 : vector<8x32xf32>
    %207 = vector.extract_strided_slice %0 {offsets = [0, 4, 0], sizes = [8, 1, 8], strides = [1, 1, 1]} : vector<8x8x8xf32> to vector<8x1x8xf32>
    %208 = vector.shape_cast %207 : vector<8x1x8xf32> to vector<8x8xf32>
    %cst_43 = arith.constant dense<0.000000e+00> : vector<8x128xf32>
    %209 = tpu.matmul %208, %2, %cst_43 {dimension_numbers = #tpu.dot_dimension_numbers<[1], [0], [0], [1], [0, 0, 1, 1], [], []>} : vector<8x8xf32>, vector<8x128xf32>, vector<8x128xf32> -> vector<8x128xf32>
    %cst_44 = arith.constant dense<0.000000e+00> : vector<8x128xf32>
    %210 = tpu.matmul %206, %3, %cst_44 {dimension_numbers = #tpu.dot_dimension_numbers<[1], [0], [0], [1], [0, 0, 1, 1], [], []>} : vector<8x32xf32>, vector<32x128xf32>, vector<8x128xf32> -> vector<8x128xf32>
    %211 = arith.addf %209, %210 : vector<8x128xf32>
    %212 = vector.broadcast %4 : vector<1x128xf32> to vector<8x128xf32>
    %213 = arith.addf %211, %212 : vector<8x128xf32>
    %214 = vector.extract_strided_slice %213 {offsets = [0, 0], sizes = [8, 32], strides = [1, 1]} : vector<8x128xf32> to vector<8x32xf32>
    %215 = arith.negf %214 : vector<8x32xf32>
    %216 = math.exp %215 : vector<8x32xf32>
    %cst_45 = arith.constant 1.000000e+00 : f32
    %217 = vector.broadcast %cst_45 : f32 to vector<8x32xf32>
    %218 = arith.addf %217, %216 : vector<8x32xf32>
    %219 = arith.divf %217, %218 : vector<8x32xf32>
    %220 = vector.extract_strided_slice %213 {offsets = [0, 32], sizes = [8, 32], strides = [1, 1]} : vector<8x128xf32> to vector<8x32xf32>
    %221 = arith.negf %220 : vector<8x32xf32>
    %222 = math.exp %221 : vector<8x32xf32>
    %cst_46 = arith.constant 1.000000e+00 : f32
    %223 = vector.broadcast %cst_46 : f32 to vector<8x32xf32>
    %224 = arith.addf %223, %222 : vector<8x32xf32>
    %225 = arith.divf %223, %224 : vector<8x32xf32>
    %226 = vector.extract_strided_slice %213 {offsets = [0, 64], sizes = [8, 32], strides = [1, 1]} : vector<8x128xf32> to vector<8x32xf32>
    %227 = math.tanh %226 : vector<8x32xf32>
    %228 = vector.extract_strided_slice %213 {offsets = [0, 96], sizes = [8, 32], strides = [1, 1]} : vector<8x128xf32> to vector<8x32xf32>
    %229 = arith.negf %228 : vector<8x32xf32>
    %230 = math.exp %229 : vector<8x32xf32>
    %cst_47 = arith.constant 1.000000e+00 : f32
    %231 = vector.broadcast %cst_47 : f32 to vector<8x32xf32>
    %232 = arith.addf %231, %230 : vector<8x32xf32>
    %233 = arith.divf %231, %232 : vector<8x32xf32>
    %234 = arith.mulf %225, %199 : vector<8x32xf32>
    %235 = arith.mulf %219, %227 : vector<8x32xf32>
    %236 = arith.addf %234, %235 : vector<8x32xf32>
    %237 = math.tanh %236 : vector<8x32xf32>
    %238 = arith.mulf %233, %237 : vector<8x32xf32>
    %cst_48 = arith.constant 4.000000e+00 : f32
    %239 = vector.broadcast %cst_48 : f32 to vector<8x1xf32>
    %240 = arith.cmpf ogt, %1, %239 : vector<8x1xf32>
    %241 = arith.extui %240 : vector<8x1xi1> to vector<8x1xi32>
    %242 = arith.sitofp %241 : vector<8x1xi32> to vector<8x1xf32>
    %243 = vector.broadcast %242 : vector<8x1xf32> to vector<8x32xf32>
    %244 = arith.mulf %243, %236 : vector<8x32xf32>
    %cst_49 = arith.constant 1.000000e+00 : f32
    %245 = vector.broadcast %cst_49 : f32 to vector<8x1xf32>
    %246 = arith.subf %245, %242 : vector<8x1xf32>
    %247 = vector.broadcast %246 : vector<8x1xf32> to vector<8x32xf32>
    %248 = arith.mulf %247, %199 : vector<8x32xf32>
    %249 = arith.addf %244, %248 : vector<8x32xf32>
    %250 = vector.broadcast %242 : vector<8x1xf32> to vector<8x32xf32>
    %251 = arith.mulf %250, %238 : vector<8x32xf32>
    %cst_50 = arith.constant 1.000000e+00 : f32
    %252 = vector.broadcast %cst_50 : f32 to vector<8x1xf32>
    %253 = arith.subf %252, %242 : vector<8x1xf32>
    %254 = vector.broadcast %253 : vector<8x1xf32> to vector<8x32xf32>
    %255 = arith.mulf %254, %206 : vector<8x32xf32>
    %256 = arith.addf %251, %255 : vector<8x32xf32>
    %257 = vector.extract_strided_slice %0 {offsets = [0, 5, 0], sizes = [8, 1, 8], strides = [1, 1, 1]} : vector<8x8x8xf32> to vector<8x1x8xf32>
    %258 = vector.shape_cast %257 : vector<8x1x8xf32> to vector<8x8xf32>
    %cst_51 = arith.constant dense<0.000000e+00> : vector<8x128xf32>
    %259 = tpu.matmul %258, %2, %cst_51 {dimension_numbers = #tpu.dot_dimension_numbers<[1], [0], [0], [1], [0, 0, 1, 1], [], []>} : vector<8x8xf32>, vector<8x128xf32>, vector<8x128xf32> -> vector<8x128xf32>
    %cst_52 = arith.constant dense<0.000000e+00> : vector<8x128xf32>
    %260 = tpu.matmul %256, %3, %cst_52 {dimension_numbers = #tpu.dot_dimension_numbers<[1], [0], [0], [1], [0, 0, 1, 1], [], []>} : vector<8x32xf32>, vector<32x128xf32>, vector<8x128xf32> -> vector<8x128xf32>
    %261 = arith.addf %259, %260 : vector<8x128xf32>
    %262 = vector.broadcast %4 : vector<1x128xf32> to vector<8x128xf32>
    %263 = arith.addf %261, %262 : vector<8x128xf32>
    %264 = vector.extract_strided_slice %263 {offsets = [0, 0], sizes = [8, 32], strides = [1, 1]} : vector<8x128xf32> to vector<8x32xf32>
    %265 = arith.negf %264 : vector<8x32xf32>
    %266 = math.exp %265 : vector<8x32xf32>
    %cst_53 = arith.constant 1.000000e+00 : f32
    %267 = vector.broadcast %cst_53 : f32 to vector<8x32xf32>
    %268 = arith.addf %267, %266 : vector<8x32xf32>
    %269 = arith.divf %267, %268 : vector<8x32xf32>
    %270 = vector.extract_strided_slice %263 {offsets = [0, 32], sizes = [8, 32], strides = [1, 1]} : vector<8x128xf32> to vector<8x32xf32>
    %271 = arith.negf %270 : vector<8x32xf32>
    %272 = math.exp %271 : vector<8x32xf32>
    %cst_54 = arith.constant 1.000000e+00 : f32
    %273 = vector.broadcast %cst_54 : f32 to vector<8x32xf32>
    %274 = arith.addf %273, %272 : vector<8x32xf32>
    %275 = arith.divf %273, %274 : vector<8x32xf32>
    %276 = vector.extract_strided_slice %263 {offsets = [0, 64], sizes = [8, 32], strides = [1, 1]} : vector<8x128xf32> to vector<8x32xf32>
    %277 = math.tanh %276 : vector<8x32xf32>
    %278 = vector.extract_strided_slice %263 {offsets = [0, 96], sizes = [8, 32], strides = [1, 1]} : vector<8x128xf32> to vector<8x32xf32>
    %279 = arith.negf %278 : vector<8x32xf32>
    %280 = math.exp %279 : vector<8x32xf32>
    %cst_55 = arith.constant 1.000000e+00 : f32
    %281 = vector.broadcast %cst_55 : f32 to vector<8x32xf32>
    %282 = arith.addf %281, %280 : vector<8x32xf32>
    %283 = arith.divf %281, %282 : vector<8x32xf32>
    %284 = arith.mulf %275, %249 : vector<8x32xf32>
    %285 = arith.mulf %269, %277 : vector<8x32xf32>
    %286 = arith.addf %284, %285 : vector<8x32xf32>
    %287 = math.tanh %286 : vector<8x32xf32>
    %288 = arith.mulf %283, %287 : vector<8x32xf32>
    %cst_56 = arith.constant 5.000000e+00 : f32
    %289 = vector.broadcast %cst_56 : f32 to vector<8x1xf32>
    %290 = arith.cmpf ogt, %1, %289 : vector<8x1xf32>
    %291 = arith.extui %290 : vector<8x1xi1> to vector<8x1xi32>
    %292 = arith.sitofp %291 : vector<8x1xi32> to vector<8x1xf32>
    %293 = vector.broadcast %292 : vector<8x1xf32> to vector<8x32xf32>
    %294 = arith.mulf %293, %286 : vector<8x32xf32>
    %cst_57 = arith.constant 1.000000e+00 : f32
    %295 = vector.broadcast %cst_57 : f32 to vector<8x1xf32>
    %296 = arith.subf %295, %292 : vector<8x1xf32>
    %297 = vector.broadcast %296 : vector<8x1xf32> to vector<8x32xf32>
    %298 = arith.mulf %297, %249 : vector<8x32xf32>
    %299 = arith.addf %294, %298 : vector<8x32xf32>
    %300 = vector.broadcast %292 : vector<8x1xf32> to vector<8x32xf32>
    %301 = arith.mulf %300, %288 : vector<8x32xf32>
    %cst_58 = arith.constant 1.000000e+00 : f32
    %302 = vector.broadcast %cst_58 : f32 to vector<8x1xf32>
    %303 = arith.subf %302, %292 : vector<8x1xf32>
    %304 = vector.broadcast %303 : vector<8x1xf32> to vector<8x32xf32>
    %305 = arith.mulf %304, %256 : vector<8x32xf32>
    %306 = arith.addf %301, %305 : vector<8x32xf32>
    %307 = vector.extract_strided_slice %0 {offsets = [0, 6, 0], sizes = [8, 1, 8], strides = [1, 1, 1]} : vector<8x8x8xf32> to vector<8x1x8xf32>
    %308 = vector.shape_cast %307 : vector<8x1x8xf32> to vector<8x8xf32>
    %cst_59 = arith.constant dense<0.000000e+00> : vector<8x128xf32>
    %309 = tpu.matmul %308, %2, %cst_59 {dimension_numbers = #tpu.dot_dimension_numbers<[1], [0], [0], [1], [0, 0, 1, 1], [], []>} : vector<8x8xf32>, vector<8x128xf32>, vector<8x128xf32> -> vector<8x128xf32>
    %cst_60 = arith.constant dense<0.000000e+00> : vector<8x128xf32>
    %310 = tpu.matmul %306, %3, %cst_60 {dimension_numbers = #tpu.dot_dimension_numbers<[1], [0], [0], [1], [0, 0, 1, 1], [], []>} : vector<8x32xf32>, vector<32x128xf32>, vector<8x128xf32> -> vector<8x128xf32>
    %311 = arith.addf %309, %310 : vector<8x128xf32>
    %312 = vector.broadcast %4 : vector<1x128xf32> to vector<8x128xf32>
    %313 = arith.addf %311, %312 : vector<8x128xf32>
    %314 = vector.extract_strided_slice %313 {offsets = [0, 0], sizes = [8, 32], strides = [1, 1]} : vector<8x128xf32> to vector<8x32xf32>
    %315 = arith.negf %314 : vector<8x32xf32>
    %316 = math.exp %315 : vector<8x32xf32>
    %cst_61 = arith.constant 1.000000e+00 : f32
    %317 = vector.broadcast %cst_61 : f32 to vector<8x32xf32>
    %318 = arith.addf %317, %316 : vector<8x32xf32>
    %319 = arith.divf %317, %318 : vector<8x32xf32>
    %320 = vector.extract_strided_slice %313 {offsets = [0, 32], sizes = [8, 32], strides = [1, 1]} : vector<8x128xf32> to vector<8x32xf32>
    %321 = arith.negf %320 : vector<8x32xf32>
    %322 = math.exp %321 : vector<8x32xf32>
    %cst_62 = arith.constant 1.000000e+00 : f32
    %323 = vector.broadcast %cst_62 : f32 to vector<8x32xf32>
    %324 = arith.addf %323, %322 : vector<8x32xf32>
    %325 = arith.divf %323, %324 : vector<8x32xf32>
    %326 = vector.extract_strided_slice %313 {offsets = [0, 64], sizes = [8, 32], strides = [1, 1]} : vector<8x128xf32> to vector<8x32xf32>
    %327 = math.tanh %326 : vector<8x32xf32>
    %328 = vector.extract_strided_slice %313 {offsets = [0, 96], sizes = [8, 32], strides = [1, 1]} : vector<8x128xf32> to vector<8x32xf32>
    %329 = arith.negf %328 : vector<8x32xf32>
    %330 = math.exp %329 : vector<8x32xf32>
    %cst_63 = arith.constant 1.000000e+00 : f32
    %331 = vector.broadcast %cst_63 : f32 to vector<8x32xf32>
    %332 = arith.addf %331, %330 : vector<8x32xf32>
    %333 = arith.divf %331, %332 : vector<8x32xf32>
    %334 = arith.mulf %325, %299 : vector<8x32xf32>
    %335 = arith.mulf %319, %327 : vector<8x32xf32>
    %336 = arith.addf %334, %335 : vector<8x32xf32>
    %337 = math.tanh %336 : vector<8x32xf32>
    %338 = arith.mulf %333, %337 : vector<8x32xf32>
    %cst_64 = arith.constant 6.000000e+00 : f32
    %339 = vector.broadcast %cst_64 : f32 to vector<8x1xf32>
    %340 = arith.cmpf ogt, %1, %339 : vector<8x1xf32>
    %341 = arith.extui %340 : vector<8x1xi1> to vector<8x1xi32>
    %342 = arith.sitofp %341 : vector<8x1xi32> to vector<8x1xf32>
    %343 = vector.broadcast %342 : vector<8x1xf32> to vector<8x32xf32>
    %344 = arith.mulf %343, %336 : vector<8x32xf32>
    %cst_65 = arith.constant 1.000000e+00 : f32
    %345 = vector.broadcast %cst_65 : f32 to vector<8x1xf32>
    %346 = arith.subf %345, %342 : vector<8x1xf32>
    %347 = vector.broadcast %346 : vector<8x1xf32> to vector<8x32xf32>
    %348 = arith.mulf %347, %299 : vector<8x32xf32>
    %349 = arith.addf %344, %348 : vector<8x32xf32>
    %350 = vector.broadcast %342 : vector<8x1xf32> to vector<8x32xf32>
    %351 = arith.mulf %350, %338 : vector<8x32xf32>
    %cst_66 = arith.constant 1.000000e+00 : f32
    %352 = vector.broadcast %cst_66 : f32 to vector<8x1xf32>
    %353 = arith.subf %352, %342 : vector<8x1xf32>
    %354 = vector.broadcast %353 : vector<8x1xf32> to vector<8x32xf32>
    %355 = arith.mulf %354, %306 : vector<8x32xf32>
    %356 = arith.addf %351, %355 : vector<8x32xf32>
    %357 = vector.extract_strided_slice %0 {offsets = [0, 7, 0], sizes = [8, 1, 8], strides = [1, 1, 1]} : vector<8x8x8xf32> to vector<8x1x8xf32>
    %358 = vector.shape_cast %357 : vector<8x1x8xf32> to vector<8x8xf32>
    %cst_67 = arith.constant dense<0.000000e+00> : vector<8x128xf32>
    %359 = tpu.matmul %358, %2, %cst_67 {dimension_numbers = #tpu.dot_dimension_numbers<[1], [0], [0], [1], [0, 0, 1, 1], [], []>} : vector<8x8xf32>, vector<8x128xf32>, vector<8x128xf32> -> vector<8x128xf32>
    %cst_68 = arith.constant dense<0.000000e+00> : vector<8x128xf32>
    %360 = tpu.matmul %356, %3, %cst_68 {dimension_numbers = #tpu.dot_dimension_numbers<[1], [0], [0], [1], [0, 0, 1, 1], [], []>} : vector<8x32xf32>, vector<32x128xf32>, vector<8x128xf32> -> vector<8x128xf32>
    %361 = arith.addf %359, %360 : vector<8x128xf32>
    %362 = vector.broadcast %4 : vector<1x128xf32> to vector<8x128xf32>
    %363 = arith.addf %361, %362 : vector<8x128xf32>
    %364 = vector.extract_strided_slice %363 {offsets = [0, 0], sizes = [8, 32], strides = [1, 1]} : vector<8x128xf32> to vector<8x32xf32>
    %365 = arith.negf %364 : vector<8x32xf32>
    %366 = math.exp %365 : vector<8x32xf32>
    %cst_69 = arith.constant 1.000000e+00 : f32
    %367 = vector.broadcast %cst_69 : f32 to vector<8x32xf32>
    %368 = arith.addf %367, %366 : vector<8x32xf32>
    %369 = arith.divf %367, %368 : vector<8x32xf32>
    %370 = vector.extract_strided_slice %363 {offsets = [0, 32], sizes = [8, 32], strides = [1, 1]} : vector<8x128xf32> to vector<8x32xf32>
    %371 = arith.negf %370 : vector<8x32xf32>
    %372 = math.exp %371 : vector<8x32xf32>
    %cst_70 = arith.constant 1.000000e+00 : f32
    %373 = vector.broadcast %cst_70 : f32 to vector<8x32xf32>
    %374 = arith.addf %373, %372 : vector<8x32xf32>
    %375 = arith.divf %373, %374 : vector<8x32xf32>
    %376 = vector.extract_strided_slice %363 {offsets = [0, 64], sizes = [8, 32], strides = [1, 1]} : vector<8x128xf32> to vector<8x32xf32>
    %377 = math.tanh %376 : vector<8x32xf32>
    %378 = vector.extract_strided_slice %363 {offsets = [0, 96], sizes = [8, 32], strides = [1, 1]} : vector<8x128xf32> to vector<8x32xf32>
    %379 = arith.negf %378 : vector<8x32xf32>
    %380 = math.exp %379 : vector<8x32xf32>
    %cst_71 = arith.constant 1.000000e+00 : f32
    %381 = vector.broadcast %cst_71 : f32 to vector<8x32xf32>
    %382 = arith.addf %381, %380 : vector<8x32xf32>
    %383 = arith.divf %381, %382 : vector<8x32xf32>
    %384 = arith.mulf %375, %349 : vector<8x32xf32>
    %385 = arith.mulf %369, %377 : vector<8x32xf32>
    %386 = arith.addf %384, %385 : vector<8x32xf32>
    %387 = math.tanh %386 : vector<8x32xf32>
    %388 = arith.mulf %383, %387 : vector<8x32xf32>
    %cst_72 = arith.constant 7.000000e+00 : f32
    %389 = vector.broadcast %cst_72 : f32 to vector<8x1xf32>
    %390 = arith.cmpf ogt, %1, %389 : vector<8x1xf32>
    %391 = arith.extui %390 : vector<8x1xi1> to vector<8x1xi32>
    %392 = arith.sitofp %391 : vector<8x1xi32> to vector<8x1xf32>
    %393 = vector.broadcast %392 : vector<8x1xf32> to vector<8x32xf32>
    %394 = arith.mulf %393, %388 : vector<8x32xf32>
    %cst_73 = arith.constant 1.000000e+00 : f32
    %395 = vector.broadcast %cst_73 : f32 to vector<8x1xf32>
    %396 = arith.subf %395, %392 : vector<8x1xf32>
    %397 = vector.broadcast %396 : vector<8x1xf32> to vector<8x32xf32>
    %398 = arith.mulf %397, %356 : vector<8x32xf32>
    %399 = arith.addf %394, %398 : vector<8x32xf32>
    %c0_74 = arith.constant 0 : index
    %c0_75 = arith.constant 0 : index
    %400 = vector.load %arg9[%c0_74, %c0_75] : memref<8x32xf32, #tpu.memory_space<vmem>>, vector<8x32xf32>
    tpu.vector_store %arg9[%c0_74, %c0_75], %399 {strides = array<i32>} : memref<8x32xf32, #tpu.memory_space<vmem>>, vector<8x32xf32>,
    %c0_76 = arith.constant 0 : index
    %c0_77 = arith.constant 0 : index
    %401 = vector.load %arg6[%c0_76, %c0_77] : memref<32x8xf32, #tpu.memory_space<vmem>>, vector<32x8xf32>
    %cst_78 = arith.constant dense<0.000000e+00> : vector<8x8xf32>
    %402 = tpu.matmul %399, %401, %cst_78 {dimension_numbers = #tpu.dot_dimension_numbers<[1], [0], [0], [1], [0, 0, 1, 1], [], []>} : vector<8x32xf32>, vector<32x8xf32>, vector<8x8xf32> -> vector<8x8xf32>
    %c0_79 = arith.constant 0 : index
    %c0_80 = arith.constant 0 : index
    %403 = vector.load %arg7[%c0_79, %c0_80] : memref<1x8xf32, #tpu.memory_space<vmem>>, vector<1x8xf32>
    %404 = vector.broadcast %403 : vector<1x8xf32> to vector<8x8xf32>
    %405 = arith.addf %402, %404 : vector<8x8xf32>
    %c0_81 = arith.constant 0 : index
    %c0_82 = arith.constant 0 : index
    %406 = vector.load %arg8[%c0_81, %c0_82] : memref<8x8xf32, #tpu.memory_space<vmem>>, vector<8x8xf32>
    tpu.vector_store %arg8[%c0_81, %c0_82], %405 {strides = array<i32>} : memref<8x8xf32, #tpu.memory_space<vmem>>, vector<8x8xf32>,
    return
  }
  func.func @transform_0(%arg0: i32) -> (i32, i32, i32) {
    %c0_i32 = arith.constant 0 : i32
    %c0_i32_0 = arith.constant 0 : i32
    %c0_i32_1 = arith.constant 0 : i32
    return %arg0, %c0_i32, %c0_i32_0 : i32, i32, i32
  }
  func.func @transform_1(%arg0: i32) -> (i32, i32) {
    %c0_i32 = arith.constant 0 : i32
    %c0_i32_0 = arith.constant 0 : i32
    return %arg0, %c0_i32 : i32, i32
  }
  func.func @transform_2(%arg0: i32) -> (i32, i32) {
    %c0_i32 = arith.constant 0 : i32
    %c0_i32_0 = arith.constant 0 : i32
    %c0_i32_1 = arith.constant 0 : i32
    return %c0_i32, %c0_i32_0 : i32, i32
  }
  func.func @transform_3(%arg0: i32) -> (i32, i32) {
    %c0_i32 = arith.constant 0 : i32
    %c0_i32_0 = arith.constant 0 : i32
    %c0_i32_1 = arith.constant 0 : i32
    return %c0_i32, %c0_i32_0 : i32, i32
  }
  func.func @transform_4(%arg0: i32) -> (i32, i32) {
    %c0_i32 = arith.constant 0 : i32
    %c0_i32_0 = arith.constant 0 : i32
    %c0_i32_1 = arith.constant 0 : i32
    return %c0_i32, %c0_i32_0 : i32, i32
  }
  func.func @transform_5(%arg0: i32) -> (i32, i32) {
    %c0_i32 = arith.constant 0 : i32
    %c0_i32_0 = arith.constant 0 : i32
    %c0_i32_1 = arith.constant 0 : i32
    return %c0_i32, %c0_i32_0 : i32, i32
  }
  func.func @transform_6(%arg0: i32) -> (i32, i32) {
    %c0_i32 = arith.constant 0 : i32
    %c0_i32_0 = arith.constant 0 : i32
    %c0_i32_1 = arith.constant 0 : i32
    return %c0_i32, %c0_i32_0 : i32, i32
  }
  func.func @transform_7(%arg0: i32) -> (i32, i32) {
    %c0_i32 = arith.constant 0 : i32
    %c0_i32_0 = arith.constant 0 : i32
    return %arg0, %c0_i32 : i32, i32
  }
  func.func @transform_8(%arg0: i32) -> (i32, i32) {
    %c0_i32 = arith.constant 0 : i32
    %c0_i32_0 = arith.constant 0 : i32
    return %arg0, %c0_i32 : i32, i32
  }
}

</mosaic_0001>

<bundles_post_ra>
// kernel: _lambda_.1
= control target key start
LH: loop header
LB: loop body
LE: loop exit
PB: predicated region body
PF: predicated region fallthrough
CT: control target
= control target key end

     0   :  { %14 = vsyncpa [#allocation3], 0  ;;  %s3225_s0 = inlined_call_operand.vmem [shape: f32[16,8,8], index: 0, kind: input, shape index: {}]   ;;  %s3226_s1 = inlined_call_operand.vmem [shape: f32[16,1], index: 1, kind: input, shape index: {}]   ;;  %s3227_s2 = inlined_call_operand.vmem [shape: f32[8,128], index: 2, kind: input, shape index: {}]   ;;  %s3228_s3 = inlined_call_operand.vmem [shape: f32[32,128], index: 3, kind: input, shape index: {}]   ;;  %s3229_s4 = inlined_call_operand.vmem [shape: f32[1,128], index: 4, kind: input, shape index: {}]   ;;  %s3230_s5 = inlined_call_operand.vmem [shape: f32[32,8], index: 5, kind: input, shape index: {}]   ;;  %s3231_s6 = inlined_call_operand.vmem [shape: f32[1,8], index: 6, kind: input, shape index: {}]   ;;  %s3232_s7 = inlined_call_operand.vmem [shape: f32[16,8], index: 7, kind: output, shape index: {0}]   ;;  %s3233_s8 = inlined_call_operand.hbm [shape: f32[16,32], index: 8, kind: output, shape index: {1}]  }
   0x1   :  { %16 = vsyncpa [#allocation3 + $0x1], 0  ;;  %s2747_s27 = smov 0   ;;  %s2749_s28 = smov 0  }
   0x2   :  { %s2751_s29 = smov 0   ;;  %s2753_s30 = smov 0  }
   0x3 LB: > { %s2768_s9 = sadd.s32 4294967295, %s2693_s30   ;;  %s2219_s10 = sadd.s32 4294967294, %s2693_s30   ;;  %s2693_s30 = sphi %s2753_s30, %s3241_s30   ;;  %s2689_s29 = sphi %s2751_s29, %s3240_s29   ;;  %s2685_s28 = sphi %s2749_s28, %s3239_s28   ;;  %s2681_s27 = sphi %s2747_s27, %s3238_s27  }
   0x4   : > { %s2772_s11 = sadd.s32 1, %s2693_s30   ;;  %s212_s12 = sadd.s32 1, %s2689_s29 }
   0x5   : > { %s209_s13 = ssub.s32 %s2693_s30, %s2772_s11  ;;  %p222_p0 = scmp.ne.s32.totalorder %s2689_s29, %s2685_s28 }
   0x6   : > { %p210_p1 = scmp.eq.s32.totalorder %s209_s13, 0  ;;  %p223_p2 = scmp.eq.s32.totalorder %s2768_s9, 1 }
   0x7   : > { %p228_p3 = scmp.ne.s32.totalorder %s2685_s28, %s2681_s27  ;;  %p229_p4 = scmp.eq.s32.totalorder %s2219_s10, 1 }
   0x8   : > { %s2783_s14 = scalar_select %p210_p1, %s2689_s29, %s212_s12  }
   0x9   : > { %p2785_p5 = por %p223_p2, %p222_p0  ;;  %p2789_p6 = por %p229_p4, %p228_p3 }
   0xa   : > { %p2222_p7 = scmp.ge.s32.totalorder %s2693_s30, 1  ;;  %p278_p8 = scmp.lt.s32.totalorder %s2693_s30, 3 }
   0xc   : > { %p279_p9 = pnand %p2222_p7, %p278_p8 }
   0xd   : > { %v344_v0 = vld [vmem:[%s3228_s3] sm:$0xff] (!%p279_p9)  ;;  %v345_v1 = vld [vmem:[%s3228_s3 + $0x8] sm:$0xff] (!%p279_p9)  ;;  %v346_v2 = vld [vmem:[%s3228_s3 + $0x10] sm:$0xff] (!%p279_p9)  ;;  %v2695_v3 = vmov (!%p279_p9), 0.0|0.0   ;;  %vm2696_vm0 = vmmov (!%p279_p9), 0   ;;  %v2697_v6 = vmov (!%p279_p9), 0.0  }
   0xe   : > { %282 = sbr.rel (%p279_p9) target bundleno = 5913 (0x1719), region = 48  ;;  %2466 = vmatprep.subr.bf16.mxu0 (!%p279_p9), %v2695_v3  ;;  %v2805_v4 = vpack.c.bf16 (!%p279_p9), %v345_v1, %v344_v0  ;;  %v347_v5 = vld [vmem:[%s3228_s3 + $0x18] sm:$0xff] (!%p279_p9)  ;;  %2335 = vmatprep.mubr.msk.f32.mxu0 (!%p279_p9), %vm2696_vm0, %v2697_v6  ;;  %s2224_s25 = sshll.u32 (!%p279_p9), %s2768_s9, 3  ;;  %v2826_v8 = vld [vmem:[%s3227_s2] sm:$0xff] (!%p279_p9)  ;;  %vm432_vm1 = vcmask (!%p279_p9), 1041409   ;;  %vm435_vm2 = vcmask (!%p279_p9), 1042434  }
   0xf   : > { %p321_p10 = scmp.lt.s32.totalorder (!%p279_p9), %s2224_s25, 15  ;;  %2472 = vmatprep.subr.bf16.mxu1 (!%p279_p9), %v2695_v3  ;;  %2351 = vmatprep.mubr.msk.f32.mxu1 (!%p279_p9), %vm2696_vm0, %v2697_v6  ;;  %v2817_v7 = vpack.c.bf16 (!%p279_p9), %v347_v5, %v346_v2  ;;  %vm438_vm3 = vcmask (!%p279_p9), 1043459   ;;  %vm441_vm4 = vcmask (!%p279_p9), 1044484   ;;  %vm444_vm5 = vcmask (!%p279_p9), 1045509   ;;  %p326_p11 = scmp.lt.s32.totalorder (!%p279_p9), %s2768_s9, 1 }
  0x10   : > { %2468 = vmatpush3.bf16.msra.mxu0 (!%p279_p9), %v2805_v4  ;;  %2474 = vmatpush3.bf16.msra.mxu1 (!%p279_p9), %v2805_v4  ;;  %vm447_vm6 = vcmask (!%p279_p9), 1046534   ;;  %vm450_vm7 = vcmask (!%p279_p9), 1047559   ;;  %vm452_vm8 = vcmask (!%p279_p9), 64512   ;;  %v2698_v31 = vmov (!%p279_p9), 0   ;;  %v2892_v37 = vld [vmem:[%s3229_s4] ss:$0 sm:$0xff] (!%p279_p9) }
  0x11   : > { %2469 = vmatprep.subr.bf16.mxu0 (!%p279_p9), %v2695_v3  ;;  %2475 = vmatprep.subr.bf16.mxu1 (!%p279_p9), %v2695_v3  ;;  %s2700_s10 = smov (!%p279_p9), 32   ;;  %vm349_vm10 = vcmask (!%p279_p9), 261120  }
  0x12   : > { %2565 = vset.pattern.permute.xlu1 (!%p279_p9), %v2698_v31  ;;  %2566 = vset.pattern.permute.xlu0 (!%p279_p9), %v2698_v31 }
  0x14   : > { %2471 = vmatpush3.bf16.msra.mxu0 (!%p279_p9), %v2817_v7  ;;  %2477 = vmatpush3.bf16.msra.mxu1 (!%p279_p9), %v2817_v7 }
  0x15   : > { %s3243_s25 = smov (!%p321_p10, %s2224_s25), 15  ;;  %2338 = vmatprep.subr.mxu0 %v2697_v6  ;;  %2478 = vmatprep.subr.bf16.mxu1 %v2695_v3 }
  0x16   : > { %s2225_s26 = sshll.u32 %s3243_s25, 3  ;;  %s317_s25 = sand.u32 1, %s2685_s28  }
  0x17   : > { %s324_s18 = scalar_lea.vmem %s3225_s0, %s2225_s26  ;;  %2336 = vmatmul.mubr.f32.vlgmr.msra.gmra.mrb[0].mxu0 %v2697_v6  ;;  %s2699_s26 = smov 64  }
  0x18   : > { %v2833_v9 = vld [vmem:[%s324_s18] sm:$0xff]  ;;  %v2835_v10 = vld [vmem:[%s324_s18 + $0x8] sm:$0xff]  ;;  %v2837_v11 = vld [vmem:[%s324_s18 + $0x10] sm:$0xff]  ;;  %2339 = vmatpush3.msra.mxu0 %v2826_v8  ;;  %2340 = vmatprep.mubr.msk.f32.mxu0 %vm2696_vm0, %v2697_v6  ;;  %s2877_s19 = scalar_select %p326_p11, %s2768_s9, 1 }
  0x19   : > { %v2840_v12 = vld [vmem:[%s324_s18 + $0x18] sm:$0xff]  ;;  %v2842_v13 = vld [vmem:[%s324_s18 + $0x20] sm:$0xff]  ;;  %v2844_v14 = vld [vmem:[%s324_s18 + $0x28] sm:$0xff]  ;;  %v431_v15 = vrot.slane %v2835_v10, 7  ;;  %v434_v16 = vrot.slane %v2837_v11, 6  ;;  %2354 = vmatprep.subr.mxu0 %v2697_v6  ;;  %v650_v52 = vrot.slane %v2833_v9, 1 }
  0x1a   : > { %v2849_v17 = vld [vmem:[%s324_s18 + $0x30] sm:$0xff]  ;;  %v2851_v18 = vld [vmem:[%s324_s18 + $0x38] sm:$0xff]  ;;  %v437_v19 = vrot.slane %v2840_v12, 5  ;;  %v440_v20 = vrot.slane %v2842_v13, 4  ;;  %v443_v22 = vrot.slane %v2844_v14, 3  ;;  %s3234_s20 = sshll.u32 %s2877_s19, 3 }
  0x1b   : > { %v433_v21 = vsel %vm432_vm1, %v431_v15, %v2833_v9  ;;  %v446_v24 = vrot.slane %v2849_v17, 2  ;;  %v449_v26 = vrot.slane %v2851_v18, 1  ;;  %s329_s23 = scalar_lea.vmem %s3226_s1, %s3234_s20  ;;  %v652_v53 = vrot.slane %v2837_v11, 7  ;;  %s2223_s12 = sshll.u32 %s317_s25, 3 }
  0x1c   : > { %v436_v23 = vsel %vm435_vm2, %v434_v16, %v433_v21  ;;  %v2885_v32 = vld [vmem:[%s329_s23] sm:$0xff]  ;;  %v654_v54 = vrot.slane %v2840_v12, 6  ;;  %v656_v55 = vrot.slane %v2842_v13, 5  ;;  %v651_v56 = vsel %vm432_vm1, %v2835_v10, %v650_v52  ;;  %s319_s13 = scalar_lea.vmem [#allocation2], %s2223_s12  ;;  %s2108_s23 = scalar_lea.sflag [#allocation3], %s317_s25 }
  0x1d   : > { %v439_v25 = vsel %vm438_vm3, %v437_v19, %v436_v23  ;;  %vm556_vm9 = vcmp.gt.f32.partialorder %v2885_v32, 0.0  ;;  %v658_v57 = vrot.slane %v2844_v14, 4  ;;  %v653_v58 = vsel %vm435_vm2, %v652_v53, %v651_v56  ;;  %s2124_s17 = sshll.u32 %s319_s13, 4  ;;  %s2125_s17 = int_to_ptr.vmem [resolvable:$true] %s2124_s17 }
  0x1e   : > { %v442_v27 = vsel %vm441_vm4, %v440_v20, %v439_v25  ;;  %v2231_v33 = vsel %vm556_vm9, 1.0, %v2697_v6  ;;  %v660_v59 = vrot.slane %v2849_v17, 3  ;;  %v655_v60 = vsel %vm438_vm3, %v654_v54, %v653_v58  ;;  %s2631_s24 = scalar_lea.vmem %s2125_s17, 128 }
  0x1f   : > { %v445_v28 = vsel %vm444_vm5, %v443_v22, %v442_v27  ;;  %561 = vperm.xlu1 %2565, %v2231_v33   ;;  %v565_v34 = vsub.f32 1.0, %v2231_v33  ;;  %v662_v61 = vrot.slane %v2851_v18, 2  ;;  %v657_v62 = vsel %vm441_vm4, %v656_v55, %v655_v60  ;;  %p2632_p12 = scmp.ne.s32.totalorder %s2125_s17, %s2631_s24 }
  0x20   : > { %v448_v29 = vsel %vm447_vm6, %v446_v24, %v445_v28  ;;  %v659_v0 = vsel %vm444_vm5, %v658_v57, %v657_v62  ;;  %vm761_vm11 = vcmp.gt.f32.partialorder %v2885_v32, 1.0  ;;  %v864_v52 = vrot.slane %v2844_v14, 5 }
  0x21   : > { %v451_v30 = vsel %vm450_vm7, %v449_v26, %v448_v29  ;;  %v661_v1 = vsel %vm447_vm6, %v660_v59, %v659_v0  ;;  %v2235_v31 = vsel %vm761_vm11, 1.0, %v2697_v6  ;;  %v866_v53 = vrot.slane %v2849_v17, 4  ;;  %p2633_p13 = pnand %p2632_p12, %p2785_p5 }
  0x22   : > { %2341 = vmatmul.mubr.msk.f32.vlgmr.msra.gmra.mrb[2].mxu0 %vm452_vm8, %v451_v30  ;;  %v663_v2 = vsel %vm450_vm7, %v662_v61, %v661_v1  ;;  %v868_v55 = vrot.slane %v2851_v18, 3  ;;  %vm967_vm12 = vcmp.gt.f32.partialorder %v2885_v32, 2.0  ;;  %vm1173_vm13 = vcmp.gt.f32.partialorder %v2885_v32, 3.0 }
  0x23   : > { %2355 = vmatpush3.msra.mxu0 %v2826_v8  ;;  %2356 = vmatprep.mubr.msk.f32.mxu0 %vm2696_vm0, %v2697_v6  ;;  %vm1379_vm14 = vcmp.gt.f32.partialorder %v2885_v32, 4.0  ;;  %vm1585_vm15 = vcmp.gt.f32.partialorder %v2885_v32, 5.0  ;;  %vm1791_vm9 = vcmp.gt.f32.partialorder %v2885_v32, 6.0  ;;  %p2634_p0 = pneg %p2633_p13 }
  0x24   : > { %2370 = vmatprep.subr.mxu0 %v2697_v6  ;;  %568 = vperm.xlu1 %2565, %v565_v34  }
  0x26   : > { %2357 = vmatmul.mubr.msk.f32.vlgmr.msra.gmra.mrb[4].mxu0 %vm452_vm8, %v663_v2 }
  0x27   : > { %2371 = vmatpush3.msra.mxu0 %v2826_v8  ;;  %2372 = vmatprep.mubr.msk.f32.mxu0 %vm2696_vm0, %v2697_v6 }
  0x28   : > { %2484 = vmatprep.subr.bf16.mxu0 %v2695_v3 }
  0x9e   : > { %v562_v5 = vpop.permute.xlu1 %561 }
  0xa3   : > { %v569_v15 = vpop.permute.xlu1 %568 }
  0xa4   : > { %v571_v20 = vmul.f32 0.0, %v569_v15 }
  0xea   : > { %v419_v35 = vpop.f32.mrb[0].mxu0 }
  0xeb   : > { %v2337_v36 = vpop.f32.mrb[1].mxu0 }
  0xf5   : > { %v521_v38 = vpop.f32.mrb[2].mxu0 }
  0xf6   : > { %v522_v39 = vadd.f32 %v521_v38, %v419_v35  ;;  %v2342_v40 = vpop.f32.mrb[3].mxu0 }
  0xf7   : > { %v770_v40 = vsub.f32 1.0, %v2235_v31 }
  0xf8   : > { %v531_v41 = vadd.f32 %v2892_v37, %v522_v39 }
  0xf9   : > { %v732_v23 = vpop.f32.mrb[4].mxu0 }
  0xfa   : > { %2567 = vtanh.f32 %v531_v41  ;;  %v2230_v43 = vmul.f32 -1.442695, %v531_v41  ;;  %v2358_v24 = vpop.f32.mrb[5].mxu0 }
  0xfc   : > { %2569 = vpow2.f32 %v2230_v43 }
 0x104   : > { %v2568_v42 = vpop.eup %2567 }
 0x105   : > { %541 = vrot.lane.b32.xlu0 %v2568_v42, %s2699_s26 }
 0x106   : > { %v2570_v44 = vpop.eup %2569 }
 0x107   : > { %v535_v45 = vadd.f32 1.0, %v2570_v44 }
 0x109   : > { %2571 = vrcp.f32 %v535_v45 }
 0x113   : > { %v2572_v46 = vpop.eup %2571 }
 0x114   : > { %v539_v49 = vmul.f32 0.0, %v2572_v46 }
 0x177   : > { %v542_v47 = vpop.permute.xlu0 %541 }
 0x178   : > { %v544_v48 = vmul.f32 %v2572_v46, %v542_v47  ;;  %v857_v47 = vrot.slane %v2835_v10, 1 }
 0x17a   : > { %546 = vrot.lane.b32.xlu0 %v544_v48, %s2700_s10  ;;  %v860_v48 = vrot.slane %v2840_v12, 7 }
 0x1ec   : > { %v547_v50 = vpop.permute.xlu0 %546 }
 0x1ed   : > { %v549_v51 = vadd.f32 %v547_v50, %v539_v49  ;;  %v862_v49 = vrot.slane %v2842_v13, 6 }
 0x1ef   : > { %2573 = vtanh.f32 %v549_v51  ;;  %v564_v41 = vmul.f32 %v562_v5, %v549_v51 }
 0x1f1   : > { %v2934_v42 = vadd.f32 %v571_v20, %v564_v41  ;;  %v1062_v41 = vrot.slane %v2833_v9, 3 }
 0x1f9   : > { %v2574_v63 = vpop.eup %2573 }
 0x1fa   : > { %552 = vrot.lane.b32.xlu0 %v2574_v63, %s2699_s26 }
 0x26c   : > { %v553_v16 = vpop.permute.xlu0 %552 }
 0x26d   : > { %v555_v19 = vmul.f32 %v2572_v46, %v553_v16  ;;  %v856_v46 = vrot.slane %v2833_v9, 2 }
 0x26f   : > { %v573_v21 = vmul.f32 %v562_v5, %v555_v19  ;;  %v858_v50 = vsel %vm432_vm1, %v857_v47, %v856_v46  ;;  %v1068_v46 = vrot.slane %v2842_v13, 7 }
 0x270   : > { %v859_v51 = vsel %vm435_vm2, %v2837_v11, %v858_v50  ;;  %v1074_v50 = vrot.slane %v2851_v18, 4 }
 0x271   : > { %v2918_v22 = vadd.f32 %v573_v21, %v571_v20  ;;  %v861_v54 = vsel %vm438_vm3, %v860_v48, %v859_v51  ;;  %v1072_v48 = vrot.slane %v2849_v17, 5 }
 0x272   : > { %v863_v56 = vsel %vm441_vm4, %v862_v49, %v861_v54 }
 0x273   : > { %576 = vrot.lane.b32.xlu1 %v2918_v22, %s2700_s10  ;;  %v865_v58 = vsel %vm444_vm5, %v864_v52, %v863_v56 }
 0x274   : > { %v867_v59 = vsel %vm447_vm6, %v866_v53, %v865_v58 }
 0x275   : > { %v869_v60 = vsel %vm450_vm7, %v868_v55, %v867_v59 }
 0x276   : > { %2373 = vmatmul.mubr.msk.f32.vlgmr.msra.gmra.mrb[6].mxu0 %vm452_vm8, %v869_v60 }
 0x277   : > { %2486 = vmatpush3.bf16.msra.mxu0 %v2805_v4  ;;  %2383 = vmatprep.mubr.msk.f32.mxu0 %vm2696_vm0, %v2697_v6 }
 0x278   : > { %2487 = vmatprep.subr.bf16.mxu0 %v2695_v3 }
 0x27b   : > { %2489 = vmatpush3.bf16.msra.mxu0 %v2817_v7 }
 0x27c   : > { %2402 = vmatprep.subr.mxu0 %v2697_v6 }
 0x2e5   : > { %v577_v25 = vpop.permute.xlu1 %576 }
 0x2e6   : > { %2352 = vmatmul.mubr.msk.f32.vlgmr.msra.gmra.mrb[0].mxu1 %vm349_vm10, %v577_v25  ;;  %v2239_v25 = vsel %vm967_vm12, 1.0, %v2697_v6 }
 0x2e7   : > { %2480 = vmatpush3.bf16.msra.mxu1 %v2805_v4  ;;  %2367 = vmatprep.mubr.msk.f32.mxu1 %vm2696_vm0, %v2697_v6 }
 0x2e8   : > { %2481 = vmatprep.subr.bf16.mxu1 %v2695_v3 }
 0x2eb   : > { %2483 = vmatpush3.bf16.msra.mxu1 %v2817_v7 }
 0x2ec   : > { %2386 = vmatprep.subr.mxu1 %v2697_v6 }
 0x349   : > { %v938_v15 = vpop.f32.mrb[6].mxu0 }
 0x34a   : > { %v2374_v16 = vpop.f32.mrb[7].mxu0 }
 0x3b9   : > { %v646_v26 = vpop.f32.mrb[0].mxu1 }
 0x3ba   : > { %v733_v27 = vadd.f32 %v732_v23, %v646_v26  ;;  %v2353_v28 = vpop.f32.mrb[1].mxu1 }
 0x3bc   : > { %v736_v29 = vadd.f32 %v2892_v37, %v733_v27 }
 0x3be   : > { %2575 = vtanh.f32 %v736_v29  ;;  %v2234_v33 = vmul.f32 -1.442695, %v736_v29 }
 0x3c0   : > { %2577 = vpow2.f32 %v2234_v33  ;;  %v976_v33 = vsub.f32 1.0, %v2239_v25 }
 0x3c8   : > { %v2576_v30 = vpop.eup %2575 }
 0x3c9   : > { %746 = vrot.lane.b32.xlu0 %v2576_v30, %s2699_s26 }
 0x3ca   : > { %v2578_v34 = vpop.eup %2577 }
 0x3cb   : > { %v740_v35 = vadd.f32 1.0, %v2578_v34 }
 0x3cd   : > { %766 = vperm.xlu0 %2566, %v2235_v31   ;;  %2579 = vrcp.f32 %v740_v35 }
 0x3d7   : > { %v2580_v36 = vpop.eup %2579 }
 0x3d8   : > { %v744_v43 = vmul.f32 %v2580_v36, %v2934_v42 }
 0x43b   : > { %v747_v38 = vpop.permute.xlu0 %746 }
 0x43c   : > { %v749_v39 = vmul.f32 %v2580_v36, %v747_v38 }
 0x43e   : > { %751 = vrot.lane.b32.xlu1 %v749_v39, %s2700_s10 }
 0x442   : > { %773 = vperm.xlu1 %2565, %v770_v40  }
 0x44c   : > { %v767_v0 = vpop.permute.xlu0 %766 }
 0x4b0   : > { %v752_v44 = vpop.permute.xlu1 %751 }
 0x4b1   : > { %v754_v45 = vadd.f32 %v752_v44, %v744_v43  ;;  %v1063_v43 = vrot.slane %v2835_v10, 2  ;;  %v1065_v44 = vrot.slane %v2837_v11, 1 }
 0x4b3   : > { %2581 = vtanh.f32 %v754_v45  ;;  %v769_v35 = vmul.f32 %v767_v0, %v754_v45  ;;  %v1064_v47 = vsel %vm432_vm1, %v1063_v43, %v1062_v41  ;;  %v1273_v41 = vrot.slane %v2840_v12, 1 }
 0x4b4   : > { %v1066_v45 = vsel %vm435_vm2, %v1065_v44, %v1064_v47  ;;  %v1278_v44 = vrot.slane %v2849_v17, 6  ;;  %v1280_v47 = vrot.slane %v2851_v18, 5 }
 0x4b5   : > { %v1067_v49 = vsel %vm438_vm3, %v2840_v12, %v1066_v45 }
 0x4b6   : > { %v1069_v52 = vsel %vm441_vm4, %v1068_v46, %v1067_v49 }
 0x4bd   : > { %v2582_v57 = vpop.eup %2581 }
 0x4be   : > { %757 = vrot.lane.b32.xlu1 %v2582_v57, %s2699_s26 }
 0x4c1   : > { %v774_v61 = vpop.permute.xlu1 %773 }
 0x4c2   : > { %v779_v1 = vmul.f32 %v774_v61, %v2918_v22  ;;  %v776_v34 = vmul.f32 %v774_v61, %v2934_v42  ;;  %v1070_v42 = vrot.slane %v2844_v14, 6 }
 0x4c4   : > { %v1071_v53 = vsel %vm444_vm5, %v1070_v42, %v1069_v52 }
 0x4c5   : > { %v1073_v54 = vsel %vm447_vm6, %v1072_v48, %v1071_v53 }
 0x4c6   : > { %v1075_v55 = vsel %vm450_vm7, %v1074_v50, %v1073_v54 }
 0x530   : > { %v758_v62 = vpop.permute.xlu1 %757 }
 0x531   : > { %v760_v63 = vmul.f32 %v2580_v36, %v758_v62  ;;  %v2976_v36 = vadd.f32 %v776_v34, %v769_v35  ;;  %v1268_v35 = vrot.slane %v2833_v9, 4 }
 0x533   : > { %v778_v2 = vmul.f32 %v767_v0, %v760_v63 }
 0x535   : > { %v2961_v5 = vadd.f32 %v779_v1, %v778_v2 }
 0x537   : > { %782 = vrot.lane.b32.xlu0 %v2961_v5, %s2700_s10 }
 0x5a9   : > { %v783_v19 = vpop.permute.xlu0 %782 }
 0x5aa   : > { %2368 = vmatmul.mubr.msk.f32.vlgmr.msra.gmra.mrb[2].mxu1 %vm349_vm10, %v783_v19 }
 0x5ab   : > { %2387 = vmatpush3.msra.mxu1 %v2826_v8  ;;  %2388 = vmatprep.mubr.msk.f32.mxu1 %vm2696_vm0, %v2697_v6 }
 0x5ac   : > { %2490 = vmatprep.subr.bf16.mxu1 %v2695_v3 }
 0x5ae   : > { %2389 = vmatmul.mubr.msk.f32.vlgmr.msra.gmra.mrb[4].mxu1 %vm452_vm8, %v1075_v55 }
 0x5af   : > { %2492 = vmatpush3.bf16.msra.mxu1 %v2805_v4  ;;  %2399 = vmatprep.mubr.msk.f32.mxu1 %vm2696_vm0, %v2697_v6 }
 0x5b0   : > { %2493 = vmatprep.subr.bf16.mxu1 %v2695_v3 }
 0x5b3   : > { %2495 = vmatpush3.bf16.msra.mxu1 %v2817_v7 }
 0x5b4   : > { %2418 = vmatprep.subr.mxu1 %v2697_v6 }
 0x67d   : > { %v852_v20 = vpop.f32.mrb[2].mxu1 }
 0x67e   : > { %v939_v21 = vadd.f32 %v938_v15, %v852_v20  ;;  %v2369_v22 = vpop.f32.mrb[3].mxu1  ;;  %v2243_v20 = vsel %vm1173_vm13, 1.0, %v2697_v6 }
 0x680   : > { %v942_v23 = vadd.f32 %v2892_v37, %v939_v21 }
 0x681   : > { %v1144_v63 = vpop.f32.mrb[4].mxu1 }
 0x682   : > { %2583 = vtanh.f32 %v942_v23  ;;  %v2238_v26 = vmul.f32 -1.442695, %v942_v23  ;;  %v2390_v0 = vpop.f32.mrb[5].mxu1 }
 0x684   : > { %2585 = vpow2.f32 %v2238_v26 }
 0x68c   : > { %v2584_v24 = vpop.eup %2583 }
 0x68d   : > { %952 = vrot.lane.b32.xlu1 %v2584_v24, %s2699_s26 }
 0x68e   : > { %v2586_v27 = vpop.eup %2585 }
 0x68f   : > { %v946_v28 = vadd.f32 1.0, %v2586_v27  ;;  %v1182_v27 = vsub.f32 1.0, %v2243_v20 }
 0x691   : > { %972 = vperm.xlu1 %2565, %v2239_v25   ;;  %2587 = vrcp.f32 %v946_v28 }
 0x69b   : > { %v2588_v29 = vpop.eup %2587 }
 0x69c   : > { %v950_v38 = vmul.f32 %v2588_v29, %v2976_v36 }
 0x6ff   : > { %v953_v30 = vpop.permute.xlu1 %952 }
 0x700   : > { %v955_v31 = vmul.f32 %v2588_v29, %v953_v30 }
 0x702   : > { %957 = vrot.lane.b32.xlu0 %v955_v31, %s2700_s10 }
 0x706   : > { %979 = vperm.xlu0 %2566, %v976_v33  }
 0x710   : > { %v973_v56 = vpop.permute.xlu1 %972 }
 0x774   : > { %v958_v39 = vpop.permute.xlu0 %957 }
 0x775   : > { %v960_v40 = vadd.f32 %v958_v39, %v950_v38  ;;  %v1269_v38 = vrot.slane %v2835_v10, 3  ;;  %v1271_v39 = vrot.slane %v2837_v11, 2 }
 0x777   : > { %2589 = vtanh.f32 %v960_v40  ;;  %v1270_v43 = vsel %vm432_vm1, %v1269_v38, %v1268_v35  ;;  %v1479_v35 = vrot.slane %v2840_v12, 2  ;;  %v1481_v38 = vrot.slane %v2842_v13, 1 }
 0x781   : > { %v2590_v51 = vpop.eup %2589 }
 0x782   : > { %963 = vrot.lane.b32.xlu1 %v2590_v51, %s2699_s26 }
 0x785   : > { %v980_v57 = vpop.permute.xlu0 %979 }
 0x786   : > { %v985_v60 = vmul.f32 %v980_v57, %v2961_v5  ;;  %v982_v28 = vmul.f32 %v980_v57, %v2976_v36  ;;  %v1276_v36 = vrot.slane %v2844_v14, 7 }
 0x7f4   : > { %v964_v58 = vpop.permute.xlu1 %963 }
 0x7f5   : > { %v966_v59 = vmul.f32 %v2588_v29, %v964_v58  ;;  %v975_v29 = vmul.f32 %v973_v56, %v960_v40  ;;  %v1272_v40 = vsel %vm435_vm2, %v1271_v39, %v1270_v43  ;;  %v1484_v39 = vrot.slane %v2849_v17, 7 }
 0x7f6   : > { %v1274_v46 = vsel %vm438_vm3, %v1273_v41, %v1272_v40  ;;  %v1486_v43 = vrot.slane %v2851_v18, 6 }
 0x7f7   : > { %v984_v61 = vmul.f32 %v973_v56, %v966_v59  ;;  %v3018_v30 = vadd.f32 %v982_v28, %v975_v29  ;;  %v1275_v42 = vsel %vm441_vm4, %v2842_v13, %v1274_v46  ;;  %v1474_v29 = vrot.slane %v2833_v9, 5 }
 0x7f8   : > { %v1277_v48 = vsel %vm444_vm5, %v1276_v36, %v1275_v42 }
 0x7f9   : > { %v3003_v62 = vadd.f32 %v985_v60, %v984_v61  ;;  %v1279_v49 = vsel %vm447_vm6, %v1278_v44, %v1277_v48 }
 0x7fa   : > { %v1281_v50 = vsel %vm450_vm7, %v1280_v47, %v1279_v49 }
 0x7fb   : > { %988 = vrot.lane.b32.xlu0 %v3003_v62, %s2700_s10 }
 0x86d   : > { %v989_v1 = vpop.permute.xlu0 %988 }
 0x86e   : > { %2384 = vmatmul.mubr.msk.f32.vlgmr.msra.gmra.mrb[8].mxu0 %vm349_vm10, %v989_v1 }
 0x86f   : > { %2403 = vmatpush3.msra.mxu0 %v2826_v8  ;;  %2404 = vmatprep.mubr.msk.f32.mxu0 %vm2696_vm0, %v2697_v6 }
 0x870   : > { %2496 = vmatprep.subr.bf16.mxu0 %v2695_v3 }
 0x872   : > { %2405 = vmatmul.mubr.msk.f32.vlgmr.msra.gmra.mrb[10].mxu0 %vm452_vm8, %v1281_v50 }
 0x873   : > { %2498 = vmatpush3.bf16.msra.mxu0 %v2805_v4  ;;  %2415 = vmatprep.mubr.msk.f32.mxu0 %vm2696_vm0, %v2697_v6 }
 0x874   : > { %2499 = vmatprep.subr.bf16.mxu0 %v2695_v3 }
 0x877   : > { %2501 = vmatpush3.bf16.msra.mxu0 %v2817_v7 }
 0x878   : > { %2434 = vmatprep.subr.mxu0 %v2697_v6 }
 0x941   : > { %v1058_v2 = vpop.f32.mrb[8].mxu0 }
 0x942   : > { %v1145_v5 = vadd.f32 %v1144_v63, %v1058_v2  ;;  %v2385_v15 = vpop.f32.mrb[9].mxu0  ;;  %v2247_v2 = vsel %vm1379_vm14, 1.0, %v2697_v6 }
 0x944   : > { %v1148_v16 = vadd.f32 %v2892_v37, %v1145_v5 }
 0x945   : > { %v1350_v58 = vpop.f32.mrb[10].mxu0 }
 0x946   : > { %2591 = vtanh.f32 %v1148_v16  ;;  %v2242_v21 = vmul.f32 -1.442695, %v1148_v16  ;;  %v2406_v59 = vpop.f32.mrb[11].mxu0 }
 0x948   : > { %2593 = vpow2.f32 %v2242_v21 }
 0x950   : > { %v2592_v19 = vpop.eup %2591 }
 0x951   : > { %1158 = vrot.lane.b32.xlu1 %v2592_v19, %s2699_s26 }
 0x952   : > { %v2594_v22 = vpop.eup %2593 }
 0x953   : > { %v1152_v23 = vadd.f32 1.0, %v2594_v22  ;;  %v1388_v22 = vsub.f32 1.0, %v2247_v2 }
 0x955   : > { %1178 = vperm.xlu1 %2565, %v2243_v20   ;;  %2595 = vrcp.f32 %v1152_v23 }
 0x95f   : > { %v2596_v24 = vpop.eup %2595 }
 0x960   : > { %v1156_v31 = vmul.f32 %v2596_v24, %v3018_v30 }
 0x9c3   : > { %v1159_v25 = vpop.permute.xlu1 %1158 }
 0x9c4   : > { %v1161_v26 = vmul.f32 %v2596_v24, %v1159_v25 }
 0x9c6   : > { %1163 = vrot.lane.b32.xlu0 %v1161_v26, %s2700_s10 }
 0x9ca   : > { %1185 = vperm.xlu0 %2566, %v1182_v27  }
 0x9d4   : > { %v1179_v52 = vpop.permute.xlu1 %1178 }
 0xa38   : > { %v1164_v33 = vpop.permute.xlu0 %1163 }
 0xa39   : > { %v1166_v34 = vadd.f32 %v1164_v33, %v1156_v31  ;;  %v1475_v31 = vrot.slane %v2835_v10, 4  ;;  %v1477_v33 = vrot.slane %v2837_v11, 3 }
 0xa3b   : > { %2597 = vtanh.f32 %v1166_v34 }
 0xa45   : > { %v2598_v45 = vpop.eup %2597 }
 0xa46   : > { %1169 = vrot.lane.b32.xlu1 %v2598_v45, %s2699_s26 }
 0xa49   : > { %v1186_v51 = vpop.permute.xlu0 %1185 }
 0xa4a   : > { %v1191_v55 = vmul.f32 %v1186_v51, %v3003_v62  ;;  %v1188_v23 = vmul.f32 %v1186_v51, %v3018_v30  ;;  %v1476_v30 = vsel %vm432_vm1, %v1475_v31, %v1474_v29  ;;  %v1685_v29 = vrot.slane %v2840_v12, 3 }
 0xa4b   : > { %v1687_v31 = vrot.slane %v2842_v13, 2 }
 0xab8   : > { %v1170_v53 = vpop.permute.xlu1 %1169 }
 0xab9   : > { %v1172_v54 = vmul.f32 %v2596_v24, %v1170_v53  ;;  %v1181_v24 = vmul.f32 %v1179_v52, %v1166_v34  ;;  %v1478_v34 = vsel %vm435_vm2, %v1477_v33, %v1476_v30 }
 0xaba   : > { %v1480_v41 = vsel %vm438_vm3, %v1479_v35, %v1478_v34 }
 0xabb   : > { %v1190_v56 = vmul.f32 %v1179_v52, %v1172_v54  ;;  %v3060_v25 = vadd.f32 %v1188_v23, %v1181_v24  ;;  %v1482_v36 = vsel %vm441_vm4, %v1481_v38, %v1480_v41  ;;  %v1680_v24 = vrot.slane %v2833_v9, 6 }
 0xabc   : > { %v1483_v44 = vsel %vm444_vm5, %v2844_v14, %v1482_v36  ;;  %v1692_v38 = vrot.slane %v2851_v18, 7 }
 0xabd   : > { %v3045_v57 = vadd.f32 %v1191_v55, %v1190_v56  ;;  %v1485_v46 = vsel %vm447_vm6, %v1484_v39, %v1483_v44 }
 0xabe   : > { %v1487_v47 = vsel %vm450_vm7, %v1486_v43, %v1485_v46 }
 0xabf   : > { %1194 = vrot.lane.b32.xlu0 %v3045_v57, %s2700_s10 }
 0xb31   : > { %v1195_v60 = vpop.permute.xlu0 %1194 }
 0xb32   : > { %2400 = vmatmul.mubr.msk.f32.vlgmr.msra.gmra.mrb[6].mxu1 %vm349_vm10, %v1195_v60 }
 0xb33   : > { %2419 = vmatpush3.msra.mxu1 %v2826_v8  ;;  %2420 = vmatprep.mubr.msk.f32.mxu1 %vm2696_vm0, %v2697_v6 }
 0xb34   : > { %2502 = vmatprep.subr.bf16.mxu1 %v2695_v3 }
 0xb36   : > { %2421 = vmatmul.mubr.msk.f32.vlgmr.msra.gmra.mrb[8].mxu1 %vm452_vm8, %v1487_v47 }
 0xb37   : > { %2504 = vmatpush3.bf16.msra.mxu1 %v2805_v4  ;;  %2431 = vmatprep.mubr.msk.f32.mxu1 %vm2696_vm0, %v2697_v6 }
 0xb38   : > { %2505 = vmatprep.subr.bf16.mxu1 %v2695_v3 }
 0xb3b   : > { %2507 = vmatpush3.bf16.msra.mxu1 %v2817_v7 }
 0xb3c   : > { %2450 = vmatprep.subr.mxu1 %v2697_v6 }
 0xc05   : > { %v1264_v61 = vpop.f32.mrb[6].mxu1 }
 0xc06   : > { %v1351_v62 = vadd.f32 %v1350_v58, %v1264_v61  ;;  %v2401_v63 = vpop.f32.mrb[7].mxu1  ;;  %v2251_v61 = vsel %vm1585_vm15, 1.0, %v2697_v6 }
 0xc08   : > { %v1354_v0 = vadd.f32 %v2892_v37, %v1351_v62 }
 0xc09   : > { %v1556_v53 = vpop.f32.mrb[8].mxu1 }
 0xc0a   : > { %2599 = vtanh.f32 %v1354_v0  ;;  %v2246_v5 = vmul.f32 -1.442695, %v1354_v0  ;;  %v2422_v54 = vpop.f32.mrb[9].mxu1 }
 0xc0b   : > { %v2255_v54 = vsel %vm1791_vm9, 1.0, %v2697_v6 }
 0xc0c   : > { %2601 = vpow2.f32 %v2246_v5 }
 0xc14   : > { %v2600_v1 = vpop.eup %2599 }
 0xc15   : > { %1364 = vrot.lane.b32.xlu1 %v2600_v1, %s2699_s26 }
 0xc16   : > { %v2602_v15 = vpop.eup %2601 }
 0xc17   : > { %v1358_v16 = vadd.f32 1.0, %v2602_v15  ;;  %v1594_v15 = vsub.f32 1.0, %v2251_v61 }
 0xc19   : > { %1384 = vperm.xlu1 %2565, %v2247_v2   ;;  %2603 = vrcp.f32 %v1358_v16 }
 0xc23   : > { %v2604_v19 = vpop.eup %2603 }
 0xc24   : > { %v1362_v26 = vmul.f32 %v2604_v19, %v3060_v25 }
 0xc87   : > { %v1365_v20 = vpop.permute.xlu1 %1364 }
 0xc88   : > { %v1367_v21 = vmul.f32 %v2604_v19, %v1365_v20 }
 0xc8a   : > { %1369 = vrot.lane.b32.xlu0 %v1367_v21, %s2700_s10 }
 0xc8e   : > { %1391 = vperm.xlu0 %2566, %v1388_v22  }
 0xc98   : > { %v1385_v42 = vpop.permute.xlu1 %1384 }
 0xcfc   : > { %v1370_v27 = vpop.permute.xlu0 %1369 }
 0xcfd   : > { %v1372_v28 = vadd.f32 %v1370_v27, %v1362_v26  ;;  %v1681_v26 = vrot.slane %v2835_v10, 5  ;;  %v1683_v27 = vrot.slane %v2837_v11, 4 }
 0xcff   : > { %2605 = vtanh.f32 %v1372_v28  ;;  %v1682_v33 = vsel %vm432_vm1, %v1681_v26, %v1680_v24  ;;  %v1897_v24 = vrot.slane %v2849_v17, 1 }
 0xd09   : > { %v2606_v40 = vpop.eup %2605 }
 0xd0a   : > { %1375 = vrot.lane.b32.xlu1 %v2606_v40, %s2699_s26 }
 0xd0d   : > { %v1392_v45 = vpop.permute.xlu0 %1391 }
 0xd0e   : > { %v1397_v50 = vmul.f32 %v1392_v45, %v3045_v57  ;;  %v1394_v16 = vmul.f32 %v1392_v45, %v3060_v25  ;;  %v1689_v25 = vrot.slane %v2844_v14, 1 }
 0xd7c   : > { %v1376_v48 = vpop.permute.xlu1 %1375 }
 0xd7d   : > { %v1378_v49 = vmul.f32 %v2604_v19, %v1376_v48  ;;  %v1387_v19 = vmul.f32 %v1385_v42, %v1372_v28  ;;  %v1684_v28 = vsel %vm435_vm2, %v1683_v27, %v1682_v33 }
 0xd7e   : > { %v1686_v35 = vsel %vm438_vm3, %v1685_v29, %v1684_v28 }
 0xd7f   : > { %v1396_v52 = vmul.f32 %v1385_v42, %v1378_v49  ;;  %v1395_v20 = vadd.f32 %v1394_v16, %v1387_v19  ;;  %v1688_v30 = vsel %vm441_vm4, %v1687_v31, %v1686_v35  ;;  %v1889_v16 = vrot.slane %v2837_v11, 5 }
 0xd80   : > { %v1690_v39 = vsel %vm444_vm5, %v1689_v25, %v1688_v30  ;;  %v1891_v19 = vrot.slane %v2840_v12, 4 }
 0xd81   : > { %v1398_v51 = vadd.f32 %v1397_v50, %v1396_v52  ;;  %v1691_v41 = vsel %vm447_vm6, %v2849_v17, %v1690_v39 }
 0xd82   : > { %v1693_v43 = vsel %vm450_vm7, %v1692_v38, %v1691_v41 }
 0xd83   : > { %1400 = vrot.lane.b32.xlu0 %v1398_v51, %s2700_s10 }
 0xdf5   : > { %v1401_v55 = vpop.permute.xlu0 %1400 }
 0xdf6   : > { %2416 = vmatmul.mubr.msk.f32.vlgmr.msra.gmra.mrb[12].mxu0 %vm349_vm10, %v1401_v55 }
 0xdf7   : > { %2435 = vmatpush3.msra.mxu0 %v2826_v8  ;;  %2436 = vmatprep.mubr.msk.f32.mxu0 %vm2696_vm0, %v2697_v6 }
 0xdf8   : > { %2508 = vmatprep.subr.bf16.mxu0 %v2695_v3 }
 0xdfa   : > { %2437 = vmatmul.mubr.msk.f32.vlgmr.msra.gmra.mrb[14].mxu0 %vm452_vm8, %v1693_v43 }
 0xdfb   : > { %2510 = vmatpush3.bf16.msra.mxu0 %v2805_v4  ;;  %2447 = vmatprep.mubr.msk.f32.mxu0 %vm2696_vm0, %v2697_v6 }
 0xdfc   : > { %2511 = vmatprep.subr.bf16.mxu0 %v2695_v3 }
 0xdff   : > { %2513 = vmatpush3.bf16.msra.mxu0 %v2817_v7 }
 0xec9   : > { %v1470_v56 = vpop.f32.mrb[12].mxu0 }
 0xeca   : > { %v1557_v58 = vadd.f32 %v1556_v53, %v1470_v56  ;;  %v2417_v59 = vpop.f32.mrb[13].mxu0 }
 0xecc   : > { %v1560_v57 = vadd.f32 %v2892_v37, %v1557_v58 }
 0xecd   : > { %v1762_v48 = vpop.f32.mrb[14].mxu0 }
 0xece   : > { %2607 = vtanh.f32 %v1560_v57  ;;  %v2250_v62 = vmul.f32 -1.442695, %v1560_v57  ;;  %v2438_v49 = vpop.f32.mrb[15].mxu0 }
 0xed0   : > { %2609 = vpow2.f32 %v2250_v62 }
 0xed8   : > { %v2608_v60 = vpop.eup %2607 }
 0xed9   : > { %1570 = vrot.lane.b32.xlu1 %v2608_v60, %s2699_s26  ;;  %v1800_v60 = vsub.f32 1.0, %v2255_v54 }
 0xeda   : > { %v2610_v63 = vpop.eup %2609 }
 0xedb   : > { %v1564_v0 = vadd.f32 1.0, %v2610_v63 }
 0xedd   : > { %1590 = vperm.xlu1 %2565, %v2251_v61   ;;  %2611 = vrcp.f32 %v1564_v0 }
 0xee7   : > { %v2612_v1 = vpop.eup %2611 }
 0xee8   : > { %v1568_v21 = vmul.f32 %v2612_v1, %v1395_v20 }
 0xf4b   : > { %v1571_v2 = vpop.permute.xlu1 %1570 }
 0xf4c   : > { %v1573_v5 = vmul.f32 %v2612_v1, %v1571_v2 }
 0xf4e   : > { %1575 = vrot.lane.b32.xlu0 %v1573_v5, %s2700_s10  ;;  %v1886_v5 = vrot.slane %v2833_v9, 7 }
 0xf52   : > { %1597 = vperm.xlu0 %2566, %v1594_v15   ;;  %v1887_v15 = vrot.slane %v2835_v10, 6 }
 0xf5c   : > { %v1591_v36 = vpop.permute.xlu1 %1590 }
 0xfc0   : > { %v1576_v22 = vpop.permute.xlu0 %1575 }
 0xfc1   : > { %v1578_v23 = vadd.f32 %v1576_v22, %v1568_v21  ;;  %v1893_v21 = vrot.slane %v2842_v13, 3  ;;  %v1888_v22 = vsel %vm432_vm1, %v1887_v15, %v1886_v5 }
 0xfc3   : > { %2613 = vtanh.f32 %v1578_v23  ;;  %v1593_v62 = vmul.f32 %v1591_v36, %v1578_v23  ;;  %v1890_v23 = vsel %vm435_vm2, %v1889_v16, %v1888_v22 }
 0xfc4   : > { %v1892_v26 = vsel %vm438_vm3, %v1891_v19, %v1890_v23 }
 0xfc5   : > { %v1894_v9 = vsel %vm441_vm4, %v1893_v21, %v1892_v26 }
 0xfcd   : > { %v2614_v34 = vpop.eup %2613 }
 0xfce   : > { %1581 = vrot.lane.b32.xlu1 %v2614_v34, %s2699_s26 }
 0xfd1   : > { %v1598_v40 = vpop.permute.xlu0 %1597 }
 0xfd2   : > { %v1603_v47 = vmul.f32 %v1598_v40, %v1398_v51  ;;  %v1600_v61 = vmul.f32 %v1598_v40, %v1395_v20  ;;  %v1895_v20 = vrot.slane %v2844_v14, 2 }
 0xfd4   : > { %v1601_v63 = vadd.f32 %v1600_v61, %v1593_v62  ;;  %v1896_v10 = vsel %vm444_vm5, %v1895_v20, %v1894_v9 }
 0xfd5   : > { %v1898_v11 = vsel %vm447_vm6, %v1897_v24, %v1896_v10 }
 0xfd6   : > { %v1899_v12 = vsel %vm450_vm7, %v2851_v18, %v1898_v11 }
0x1040   : > { %v1582_v44 = vpop.permute.xlu1 %1581 }
0x1041   : > { %v1584_v46 = vmul.f32 %v2612_v1, %v1582_v44 }
0x1043   : > { %v1602_v42 = vmul.f32 %v1591_v36, %v1584_v46 }
0x1045   : > { %v1604_v45 = vadd.f32 %v1603_v47, %v1602_v42 }
0x1047   : > { %1606 = vrot.lane.b32.xlu0 %v1604_v45, %s2700_s10 }
0x10b9   : > { %v1607_v50 = vpop.permute.xlu0 %1606 }
0x10ba   : > { %2432 = vmatmul.mubr.msk.f32.vlgmr.msra.gmra.mrb[10].mxu1 %vm349_vm10, %v1607_v50 }
0x10bb   : > { %2451 = vmatpush3.msra.mxu1 %v2826_v8  ;;  %2452 = vmatprep.mubr.msk.f32.mxu1 %vm2696_vm0, %v2697_v6 }
0x10bc   : > { %2514 = vmatprep.subr.bf16.mxu1 %v2695_v3 }
0x10be   : > { %2453 = vmatmul.mubr.msk.f32.vlgmr.msra.gmra.mrb[12].mxu1 %vm452_vm8, %v1899_v12 }
0x10bf   : > { %2463 = vmatprep.mubr.msk.f32.mxu1 %vm2696_vm0, %v2697_v6  ;;  %vm1997_vm0 = vcmp.gt.f32.partialorder %v2885_v32, 7.0 }
0x10c0   : > { %v2259_v43 = vsel %vm1997_vm0, 1.0, %v2697_v6  ;;  %v2019_v6 = vld [vmem:[%s3230_s5] sm:$0xff] }
0x118d   : > { %v1676_v4 = vpop.f32.mrb[10].mxu1 }
0x118e   : > { %v1763_v7 = vadd.f32 %v1762_v48, %v1676_v4  ;;  %v2433_v52 = vpop.f32.mrb[11].mxu1 }
0x118f   : > { %v2021_v52 = vld [vmem:[%s3230_s5 + $0x10] sm:$0xff] }
0x1190   : > { %v1766_v51 = vadd.f32 %v2892_v37, %v1763_v7  ;;  %v2020_v7 = vld [vmem:[%s3230_s5 + $0x8] sm:$0xff] }
0x1191   : > { %v1968_v28 = vpop.f32.mrb[12].mxu1 }
0x1192   : > { %2615 = vtanh.f32 %v1766_v51  ;;  %v2254_v8 = vmul.f32 -1.442695, %v1766_v51  ;;  %v2454_v35 = vpop.f32.mrb[13].mxu1  ;;  %v2515_v51 = vpack.c.bf16 %v2020_v7, %v2019_v6 }
0x1194   : > { %2617 = vpow2.f32 %v2254_v8  ;;  %2516 = vmatpush3.bf16.msra.mxu1 %v2515_v51 }
0x1195   : > { %2517 = vmatprep.subr.bf16.mxu1 %v2695_v3 }
0x119c   : > { %v2616_v53 = vpop.eup %2615 }
0x119d   : > { %1776 = vrot.lane.b32.xlu1 %v2616_v53, %s2699_s26  ;;  %v2022_v53 = vld [vmem:[%s3230_s5 + $0x18] sm:$0xff] }
0x119e   : > { %v2618_v55 = vpop.eup %2617 }
0x119f   : > { %v1770_v56 = vadd.f32 1.0, %v2618_v55 }
0x11a1   : > { %1796 = vperm.xlu1 %2565, %v2255_v54   ;;  %2619 = vrcp.f32 %v1770_v56  ;;  %v2518_v54 = vpack.c.bf16 %v2022_v53, %v2021_v52 }
0x11a3   : > { %2519 = vmatpush3.bf16.msra.mxu1 %v2518_v54 }
0x11ab   : > { %v2620_v58 = vpop.eup %2619 }
0x11ac   : > { %v1774_v0 = vmul.f32 %v2620_v58, %v1601_v63 }
0x120f   : > { %v1777_v59 = vpop.permute.xlu1 %1776 }
0x1210   : > { %v1779_v57 = vmul.f32 %v2620_v58, %v1777_v59 }
0x1212   : > { %1781 = vrot.lane.b32.xlu0 %v1779_v57, %s2700_s10 }
0x1216   : > { %1803 = vperm.xlu0 %2566, %v1800_v60  }
0x1220   : > { %v1797_v13 = vpop.permute.xlu1 %1796 }
0x1284   : > { %v1782_v1 = vpop.permute.xlu0 %1781 }
0x1285   : > { %v1784_v2 = vadd.f32 %v1782_v1, %v1774_v0 }
0x1287   : > { %2621 = vtanh.f32 %v1784_v2  ;;  %v1799_v32 = vmul.f32 %v1797_v13, %v1784_v2 }
0x1291   : > { %v2622_v27 = vpop.eup %2621 }
0x1292   : > { %1787 = vrot.lane.b32.xlu1 %v2622_v27, %s2699_s26 }
0x1295   : > { %v1804_v14 = vpop.permute.xlu0 %1803 }
0x1296   : > { %v1809_v31 = vmul.f32 %v1804_v14, %v1604_v45  ;;  %v2006_v45 = vsub.f32 1.0, %v2259_v43 }
0x1304   : > { %v1788_v17 = vpop.permute.xlu1 %1787 }
0x1305   : > { %v1790_v29 = vmul.f32 %v2620_v58, %v1788_v17 }
0x1307   : > { %v1808_v33 = vmul.f32 %v1797_v13, %v1790_v29 }
0x1309   : > { %v1810_v25 = vadd.f32 %v1809_v31, %v1808_v33 }
0x130b   : > { %1812 = vrot.lane.b32.xlu0 %v1810_v25, %s2700_s10 }
0x137d   : > { %v1813_v38 = vpop.permute.xlu0 %1812 }
0x137e   : > { %2448 = vmatmul.mubr.msk.f32.vlgmr.msra.gmra.mrb[16].mxu0 %vm349_vm10, %v1813_v38 }
0x1451   : > { %v1882_v18 = vpop.f32.mrb[16].mxu0 }
0x1452   : > { %v1969_v30 = vadd.f32 %v1968_v28, %v1882_v18  ;;  %v2449_v34 = vpop.f32.mrb[17].mxu0 }
0x1454   : > { %v1972_v39 = vadd.f32 %v2892_v37, %v1969_v30  ;;  %v1806_v37 = vmul.f32 %v1804_v14, %v1601_v63 }
0x1456   : > { %2623 = vtanh.f32 %v1972_v39  ;;  %v2258_v36 = vmul.f32 -1.442695, %v1972_v39  ;;  %v1807_v48 = vadd.f32 %v1806_v37, %v1799_v32 }
0x1458   : > { %2625 = vpow2.f32 %v2258_v36 }
0x1460   : > { %v2624_v41 = vpop.eup %2623 }
0x1461   : > { %1982 = vrot.lane.b32.xlu1 %v2624_v41, %s2699_s26 }
0x1462   : > { %v2626_v40 = vpop.eup %2625 }
0x1463   : > { %v1976_v44 = vadd.f32 1.0, %v2626_v40 }
0x1465   : > { %2002 = vperm.xlu1 %2565, %v2259_v43   ;;  %2627 = vrcp.f32 %v1976_v44 }
0x146f   : > { %v2628_v46 = vpop.eup %2627 }
0x1470   : > { %v1980_v49 = vmul.f32 %v2628_v46, %v1807_v48 }
0x14d3   : > { %v1983_v47 = vpop.permute.xlu1 %1982 }
0x14d4   : > { %v1985_v42 = vmul.f32 %v2628_v46, %v1983_v47 }
0x14d6   : > { %1987 = vrot.lane.b32.xlu0 %v1985_v42, %s2700_s10 }
0x14da   : > { %2009 = vperm.xlu0 %2566, %v2006_v45  }
0x14e4   : > { %v2003_v55 = vpop.permute.xlu1 %2002 }
0x1548   : > { %v1988_v50 = vpop.permute.xlu0 %1987 }
0x1549   : > { %v1990_v4 = vadd.f32 %v1988_v50, %v1980_v49 }
0x154b   : > { %2629 = vtanh.f32 %v1990_v4 }
0x1555   : > { %v2630_v8 = vpop.eup %2629 }
0x1556   : > { %1993 = vrot.lane.b32.xlu1 %v2630_v8, %s2699_s26  ;;  %s2263_s26 = sshll.u32 %s2768_s9, 7 }
0x1557   : > { %s3180_s22 = scalar_lea.hbm %s3233_s8, %s2263_s26 }
0x1559   : > { %v2010_v56 = vpop.permute.xlu0 %2009 }
0x155a   : > { %v2012_v57 = vmul.f32 %v2010_v56, %v1810_v25 }
0x15c8   : > { %v1994_v58 = vpop.permute.xlu1 %1993 }
0x15c9   : > { %v1996_v59 = vmul.f32 %v2628_v46, %v1994_v58 }
0x15cb   : > { %v2005_v60 = vmul.f32 %v2003_v55, %v1996_v59 }
0x15cd   : > { %v2013_v61 = vadd.f32 %v2012_v57, %v2005_v60 }
0x15cf   : > { %2015 = vrot.lane.b32.xlu0 %v2013_v61, %s2700_s10  ;;  %s2701_s10 = smov [#allocation2]  }
0x15d0   : > { %s2635_s12 = sshll.u32 %s2701_s10, 4  ;;  %s2636_s12 = int_to_ptr.vmem [resolvable:$false] %s2635_s12 }
0x15d1   : > { %s2637_s20 = scalar_lea.vmem %s2636_s12, 256  ;;  %p2638_p1 = scmp.lt.s32.totalorder %s2125_s17, %s2636_s12 }
0x15d2   : > { %p2639_p2 = scmp.lt.s32.totalorder %s2637_s20, %s2631_s24 }
0x15d4   : > { %p2640_p3 = por %p2639_p2, %p2638_p1 }
0x15d6   : > { %p2641_p4 = pnand %p2640_p3, %p2634_p0 }
0x1641   : > { %v2016_v62 = vpop.permute.xlu0 %2015 }
0x1642   : > { %2018 = vst.msk [vmem:[%s319_s13] sm:$0xff] %vm349_vm10, %v2016_v62  ;;  %2464 = vmatmul.mubr.msk.f32.vlgmr.msra.gmra.mrb[14].mxu1 %vm349_vm10, %v2016_v62 }
0x1643   : > { %2644 = shalt.err (!%p2641_p4)
}
0x1644   : > { %s2645_s9 = scalar_lea.hbm %s3180_s22, 128  ;;  %s2649_s26 = scalar_lea.hbm %s3233_s8, 256 }
0x1645   : > { %p2646_p7 = scmp.ne.s32.totalorder %s3180_s22, %s2645_s9  ;;  %p2650_p10 = scmp.lt.u32.totalorder %s3180_s22, %s3233_s8 }
0x1646   : > { %p2651_p11 = scmp.lt.u32.totalorder %s2649_s26, %s2645_s9  ;;  %p2653_p13 = scmp.lt.u32.totalorder %s2645_s9, %s3180_s22 }
0x1647   : > { %p2647_p8 = pnand %p2646_p7, %p2785_p5 }
0x1648   : > { %p2652_p12 = por %p2651_p11, %p2650_p10 }
0x1649   : > { %p2648_p9 = pneg %p2647_p8 }
0x164a   : > { %p2654_p0 = por %p2653_p13, %p2652_p12 }
0x164c   : > { %p2655_p1 = pnand %p2654_p0, %p2648_p9 }
0x164e   : > { %2658 = shalt.err (!%p2655_p1)
}
0x164f   : > { %2520 = dma.vmem_to_hbm [thread:$0]  (%p2785_p5), %s2125_s17, 128, %s3180_s22, %s2108_s23   ;;  %v2260_v3 = vld [vmem:[%s3231_s6] ss:$0 sm:$0xff] }
0x1650   : > { %s3237_s10 = sshll.u32 %s2877_s19, 3 }
0x1651   : > { %s333_s13 = scalar_lea.vmem %s3232_s7, %s3237_s10 }
0x1715   : > { %v2098_v63 = vpop.f32.mrb[14].mxu1 }
0x1716   : > { %v2099_v0 = vadd.f32 %v2260_v3, %v2098_v63  ;;  %v2465_v1 = vpop.f32.mrb[15].mxu1 }
0x1718   : > { %2102 = vst.msk [vmem:[%s333_s13] sm:$0xff] %vm452_vm8, %v2099_v0 }
0x1719 PF: > { %p2526_p2 = scmp.ge.s32.totalorder %s2693_s30, 2  ;;  %s2143_s15 = sand.u32 1, %s2681_s27  }
0x171a   : > { %s2144_s17 = scalar_lea.sflag [#allocation3], %s2143_s15 }
0x171b   : > { %p2523_p5 = pnand %p2526_p2, %p2789_p6 }
0x171d   : > { %2676 = dma.done.wait (!%p2523_p5), %s2144_s17, 128  }
0x171e   : > { %2678 = vsyncadd (!%p2523_p5), %s2144_s17, 4294967168  ;;  %p19_p3 = scmp.ge.s32.totalorder %s2772_s11, 4   ;;  %s3238_s27 = smov %s2685_s28 }
0x171f   : > { %s3239_s28 = smov %s2689_s29  ;;  %s3240_s29 = smov %s2783_s14 }
0x1720   : > { %s3241_s30 = smov %s2772_s11  ;;  %21 = sbr.rel (!%p19_p3) target bundleno = 3 (0x3), region = 98 }
0x1727   :  { %2149 = vsyncpa [#allocation3], 1 }
0x1728   :  { %2151 = vsyncpa [#allocation3 + $0x1], 1 }

</bundles_post_ra>
